<compile_context>
chip_gen: v6e
topology: v6e:2x2x1
jax: 0.10.0
libtpu: 0.0.40
codegen_flags: <defaults>
</compile_context>

<pallas_src>
import functools

import jax
import jax.numpy as jnp
from jax.experimental import pallas as pl
from jax.experimental.pallas import tpu as pltpu

BN_EPS = 1e-5
LANE = 128        # all feature dims padded to a multiple of this
NODE_PAD = 256    # node count padded to a multiple of 256 (MXU friendly)
ROW_TILE = 256    # target A_hat row strip per grid step (256x256 MXU granule)
SUBLANE = 8


def _round_up(v, m):
    return (v + m - 1) // m * m


def _pad2d(a, rows, cols):
    return jnp.pad(a, ((0, rows - a.shape[0]), (0, cols - a.shape[1])))


def _vmem_capacity_bytes():
    """Physical VMEM of the attached TPU (fallback: 64 MiB, the v7x size)."""
    default = 64 * 1024 * 1024
    get_info = getattr(pltpu, "get_tpu_info", None)
    if get_info is None:
        return default
    try:
        info = get_info()
    except Exception:
        return default
    for name in ("vmem_capacity_bytes", "vmem_size_bytes", "vmem_bytes"):
        val = getattr(info, name, None)
        if isinstance(val, int) and val > 0:
            return val
    return default


def _estimate_vmem_bytes(n_pad, c_pad, g_pad, tm, a_resident):
    """Conservative footprint (assume Pallas double-buffers every BlockSpec)."""
    bf16, f32 = 2, 4
    total = 0
    total += 2 * n_pad * c_pad * bf16          # x (resident block, 2 buffers)
    total += 2 * g_pad * n_pad * bf16          # pool matrix
    total += 2 * c_pad * c_pad * bf16          # per-layer conv W block
    total += 2 * c_pad * f32                   # per-layer conv b block
    total += 2 * 2 * c_pad * c_pad * bf16      # fc1 / fc2 W
    total += 2 * 2 * c_pad * f32               # fc1 / fc2 b
    total += 2 * g_pad * c_pad * f32           # output slab
    total += 2 * n_pad * c_pad * bf16          # h ping-pong scratch
    if a_resident:
        total += 2 * n_pad * n_pad * bf16      # resident A_hat
    else:
        total += 2 * tm * n_pad * bf16         # streamed A strip (double buf)
    return total


# ----------------------------------------------------------------------------
# Fused Pallas kernel: 5 x (GCNConv + folded-BN [+ ReLU]) -> pool -> FC head
# ----------------------------------------------------------------------------
def _gcn_fused_kernel(a_ref, x_ref, pool_ref, wc_ref, bc_ref,
                      w1_ref, b1_ref, w2_ref, b2_ref, o_ref,
                      h_buf, *, num_layers, tm, a_resident):
    layer = pl.program_id(0)
    tile = pl.program_id(1)
    n_tiles = pl.num_programs(1)

    src = layer % 2        # buffer holding the previous layer's node features
    dst = 1 - src          # buffer receiving this layer's node features

    # Layer 0 reads the (padded, bf16) input features directly; later layers
    # read the resident ping-pong buffer.  (Select, no VMEM->VMEM copy.)
    h_prev = jnp.where(layer == 0, x_ref[...], h_buf[src])

    row0 = pl.multiple_of(tile * tm, tm)
    if a_resident:
        a_strip = a_ref[pl.ds(row0, tm), :]    # slice the resident A_hat
    else:
        a_strip = a_ref[...]                   # streamed (tm, N) strip

    # Reassociated layer:  (A_strip @ h_prev) @ W_eff + b_eff,  f32 accumulate.
    agg = jnp.dot(a_strip, h_prev, preferred_element_type=jnp.float32)
    acc = jnp.dot(agg.astype(jnp.bfloat16), wc_ref[0],
                  preferred_element_type=jnp.float32) + bc_ref[0]
    # ReLU follows conv1..conv4; conv5 feeds the pooling directly (no ReLU).
    acc = jnp.where(layer < num_layers - 1, jnp.maximum(acc, 0.0), acc)
    h_buf[dst, pl.ds(row0, tm), :] = acc.astype(h_buf.dtype)

    # Head, run once on the very last grid step:
    # global_mean_pool -> relu -> fc1 -> relu -> dropout(eval no-op) -> fc2.
    @pl.when(jnp.logical_and(layer == num_layers - 1, tile == n_tiles - 1))
    def _():
        pooled = jnp.dot(pool_ref[...], h_buf[dst],
                         preferred_element_type=jnp.float32)
        pooled = jnp.maximum(pooled, 0.0)
        z = jnp.dot(pooled.astype(jnp.bfloat16), w1_ref[...],
                    preferred_element_type=jnp.float32) + b1_ref[...]
        z = jnp.maximum(z, 0.0)
        # TODO(synk): F.dropout(p=0.25) is identity under eval semantics.
        y = jnp.dot(z.astype(jnp.bfloat16), w2_ref[...],
                    preferred_element_type=jnp.float32) + b2_ref[...]
        o_ref[...] = y            # lane-dense (G_pad, 128) slab; col 0 is real


def _gcn_fused_call(a_hat, x_pad, pool_mat, w_stack, b_stack,
                    w1, b1, w2, b2, *, tm, a_resident, vmem_limit_bytes):
    n_pad, c_pad = x_pad.shape
    g_pad = pool_mat.shape[0]
    num_layers = w_stack.shape[0]
    n_tiles = n_pad // tm

    kern = functools.partial(_gcn_fused_kernel, num_layers=num_layers,
                             tm=tm, a_resident=a_resident)

    if a_resident:
        # Constant index map -> A_hat is DMA'd from HBM once and stays in VMEM
        # for all layers (5x traffic cut vs. re-streaming it per layer).
        a_spec = pl.BlockSpec((n_pad, n_pad), lambda l, i: (0, 0))
    else:
        # Fallback for graphs too large for residency: stream row strips.
        # TODO(synk): compress streamed A_hat (fp8 on v7x / int8+scale on
        # v5e/v6e) and, longer term, use a CSR scalar-prefetch gather.
        a_spec = pl.BlockSpec((tm, n_pad), lambda l, i: (i, 0))

    return pl.pallas_call(
        kern,
        out_shape=jax.ShapeDtypeStruct((g_pad, c_pad), jnp.float32),
        grid_spec=pltpu.PrefetchScalarGridSpec(
            num_scalar_prefetch=0,
            grid=(num_layers, n_tiles),
            in_specs=[
                a_spec,                                                   # A_hat
                pl.BlockSpec((n_pad, c_pad), lambda l, i: (0, 0)),        # x (resident)
                pl.BlockSpec((g_pad, n_pad), lambda l, i: (0, 0)),        # pool (resident)
                pl.BlockSpec((1, c_pad, c_pad), lambda l, i: (l, 0, 0)),  # conv W (per layer)
                pl.BlockSpec((1, 1, c_pad), lambda l, i: (l, 0, 0)),      # conv b (per layer)
                pl.BlockSpec((c_pad, c_pad), lambda l, i: (0, 0)),        # fc1 W
                pl.BlockSpec((1, c_pad), lambda l, i: (0, 0)),            # fc1 b
                pl.BlockSpec((c_pad, c_pad), lambda l, i: (0, 0)),        # fc2 W
                pl.BlockSpec((1, c_pad), lambda l, i: (0, 0)),            # fc2 b
            ],
            out_specs=pl.BlockSpec((g_pad, c_pad), lambda l, i: (0, 0)),
            scratch_shapes=[
                pltpu.VMEM((2, n_pad, c_pad), jnp.bfloat16),   # ping-pong h
            ],
        ),
        compiler_params=pltpu.CompilerParams(
            # Both grid axes carry state through VMEM scratch (layers are
            # sequential; every row strip reads the full previous-layer h),
            # so both must be "arbitrary".
            # TODO(synk): v7x dual-TC split of the row axis (CORE_PARALLEL +
            # VMEM_SHARED h_buf + core_barrier per layer) for up to ~2x.
            dimension_semantics=("arbitrary", "arbitrary"),
            vmem_limit_bytes=int(vmem_limit_bytes),
        ),
    )(a_hat, x_pad, pool_mat, w_stack, b_stack, w1, b1, w2, b2)


# ----------------------------------------------------------------------------
# JAX glue: normalized adjacency, pool matrix, BN folding, padding
# ----------------------------------------------------------------------------
def build_normalized_adjacency(edge_index, edge_weight, num_nodes, n_pad):
    """PyG gcn_norm: add self loops (w=1), D^-1/2 A D^-1/2, aggregate at target."""
    # TODO(synk): for production graph sizes replace this dense O(N^2) A_hat by
    # a CSR scalar-prefetch gather kernel.
    row, col = edge_index[0], edge_index[1]
    loop = jnp.arange(num_nodes, dtype=edge_index.dtype)
    row = jnp.concatenate([row, loop])
    col = jnp.concatenate([col, loop])
    ew = jnp.concatenate(
        [edge_weight.astype(jnp.float32), jnp.ones((num_nodes,), jnp.float32)])
    deg = jnp.zeros((num_nodes,), jnp.float32).at[col].add(ew)
    dinv = jnp.where(deg > 0, jax.lax.rsqrt(deg), 0.0)
    norm = dinv[row] * ew * dinv[col]
    # out[i] = sum over edges (src=j, dst=i) norm * x[j]  ->  A_hat[i, j] += norm
    a_hat = jnp.zeros((n_pad, n_pad), jnp.float32).at[col, row].add(norm)
    return a_hat.astype(jnp.bfloat16)   # bf16 MXU operand; f32 acc in kernel


def build_pool_matrix(batch, num_graphs, num_nodes, g_pad, n_pad):
    """(g_pad, n_pad) mean-pool matrix; padded rows/cols are exactly zero."""
    batch_p = jnp.full((n_pad,), g_pad, dtype=jnp.int32)   # pad id matches no row
    batch_p = batch_p.at[:num_nodes].set(batch.astype(jnp.int32))
    onehot = (batch_p[None, :] ==
              jnp.arange(g_pad, dtype=jnp.int32)[:, None]).astype(jnp.float32)
    counts = jnp.maximum(onehot.sum(axis=1, keepdims=True), 1.0)
    return (onehot / counts).astype(jnp.bfloat16)


def _fold_and_pack_params(params, c_pad):
    """Fold eval-mode BN into W/b, pad everything lane-dense, stack per layer."""
    w_list, b_list = [], []
    for layer in params["convs"]:
        scale = layer["gamma"] * jax.lax.rsqrt(layer["var"] + BN_EPS)  # (1, cout)
        w_eff = layer["w"] * scale
        b_eff = (layer["b"] - layer["mean"]) * scale + layer["beta"]
        w_list.append(_pad2d(w_eff, c_pad, c_pad).astype(jnp.bfloat16))
        b_list.append(_pad2d(b_eff, 1, c_pad))
    w_stack = jnp.stack(w_list)                       # (L, c_pad, c_pad) bf16
    b_stack = jnp.stack(b_list)                       # (L, 1, c_pad) f32
    w1 = _pad2d(params["fc1_w"], c_pad, c_pad).astype(jnp.bfloat16)
    b1 = _pad2d(params["fc1_b"], 1, c_pad)
    w2 = _pad2d(params["fc2_w"], c_pad, c_pad).astype(jnp.bfloat16)
    b2 = _pad2d(params["fc2_b"], 1, c_pad)
    return w_stack, b_stack, w1, b1, w2, b2


# ----------------------------------------------------------------------------
# Full model forward
# ----------------------------------------------------------------------------
def gcn_forward(params, x, edge_index, edge_weight, batch, num_graphs):
    n, c_in = x.shape
    dims = [c_in] + [l["w"].shape[1] for l in params["convs"]]
    dims += [params["fc1_w"].shape[1], params["fc2_w"].shape[1]]
    c_pad = _round_up(max(dims), LANE)           # all padded widths equal c_pad
    n_pad = _round_up(n, NODE_PAD)
    g_pad = _round_up(num_graphs, SUBLANE)
    tm = min(ROW_TILE, n_pad)                    # collapses grid at toy sizes

    # Per-generation VMEM budgeting (v7x has 64 MiB, v5e/v6e 128 MiB).
    vmem_phys = _vmem_capacity_bytes()
    budget = int(vmem_phys * 0.75)
    a_resident = _estimate_vmem_bytes(n_pad, c_pad, g_pad, tm, True) <= budget
    footprint = _estimate_vmem_bytes(n_pad, c_pad, g_pad, tm, a_resident)
    vmem_limit = max(32 * 1024 * 1024,
                     min(int(vmem_phys * 0.85), footprint + (16 << 20)))

    a_hat = build_normalized_adjacency(edge_index, edge_weight, n, n_pad)
    pool_mat = build_pool_matrix(batch, num_graphs, n, g_pad, n_pad)
    x_pad = _pad2d(x, n_pad, c_pad).astype(jnp.bfloat16)
    w_stack, b_stack, w1, b1, w2, b2 = _fold_and_pack_params(params, c_pad)

    out = _gcn_fused_call(a_hat, x_pad, pool_mat, w_stack, b_stack,
                          w1, b1, w2, b2, tm=tm, a_resident=a_resident,
                          vmem_limit_bytes=vmem_limit)
    return out[:num_graphs, 0]                   # slice the lane-dense slab


# Pure-JAX (f32, unfolded BN) reference of the exact PyTorch forward.
def gcn_reference(params, x, edge_index, edge_weight, batch, num_graphs):
    n = x.shape[0]
    row, col = edge_index[0], edge_index[1]
    loop = jnp.arange(n, dtype=edge_index.dtype)
    row = jnp.concatenate([row, loop])
    col = jnp.concatenate([col, loop])
    ew = jnp.concatenate([edge_weight.astype(jnp.float32),
                          jnp.ones((n,), jnp.float32)])
    deg = jnp.zeros((n,), jnp.float32).at[col].add(ew)
    dinv = jnp.where(deg > 0, jax.lax.rsqrt(deg), 0.0)
    norm = dinv[row] * ew * dinv[col]
    a = jnp.zeros((n, n), jnp.float32).at[col, row].add(norm)

    h = x
    num_layers = len(params["convs"])
    for li, layer in enumerate(params["convs"]):
        h = a @ (h @ layer["w"]) + layer["b"]
        scale = layer["gamma"] * jax.lax.rsqrt(layer["var"] + BN_EPS)
        h = (h - layer["mean"]) * scale + layer["beta"]
        if li < num_layers - 1:
            h = jnp.maximum(h, 0.0)
    onehot = (batch[None, :] ==
              jnp.arange(num_graphs, dtype=jnp.int32)[:, None]).astype(jnp.float32)
    pooled = (onehot @ h) / jnp.maximum(onehot.sum(axis=1, keepdims=True), 1.0)
    pooled = jnp.maximum(pooled, 0.0)
    z = jnp.maximum(pooled @ params["fc1_w"] + params["fc1_b"], 0.0)
    y = z @ params["fc2_w"] + params["fc2_b"]
    return y[:, 0]


def init_params(key, num_features, hidden_dim):
    dims = [
        (num_features, hidden_dim),
        (hidden_dim, hidden_dim * 2),
        (hidden_dim * 2, hidden_dim * 4),
        (hidden_dim * 4, hidden_dim * 4),
        (hidden_dim * 4, hidden_dim * 4),
    ]
    convs = []
    for (cin, cout) in dims:
        key, kw, kb, kg, kbeta, km, kv = jax.random.split(key, 7)
        convs.append(dict(
            w=jax.random.normal(kw, (cin, cout), jnp.float32) / jnp.sqrt(cin),
            b=0.1 * jax.random.normal(kb, (1, cout), jnp.float32),
            gamma=1.0 + 0.1 * jax.random.normal(kg, (1, cout), jnp.float32),
            beta=0.1 * jax.random.normal(kbeta, (1, cout), jnp.float32),
            mean=0.1 * jax.random.normal(km, (1, cout), jnp.float32),
            var=jax.random.uniform(kv, (1, cout), jnp.float32, 0.5, 1.5),
        ))
    h4, h2 = hidden_dim * 4, hidden_dim * 2
    key, k1, k2, k3, k4 = jax.random.split(key, 5)
    return dict(
        convs=convs,
        # torch Linear stores (out, in); we keep the transposed (in, out).
        fc1_w=jax.random.normal(k1, (h4, h2), jnp.float32) / jnp.sqrt(h4),
        fc1_b=0.1 * jax.random.normal(k2, (1, h2), jnp.float32),
        fc2_w=jax.random.normal(k3, (h2, 1), jnp.float32) / jnp.sqrt(h2),
        fc2_b=0.1 * jax.random.normal(k4, (1, 1), jnp.float32),
    )


if __name__ == "__main__":
    NUM_FEATURES = 16
    HIDDEN_DIM = 32
    NUM_NODES = 64
    NUM_EDGES = 256
    NUM_GRAPHS = 4

    root = jax.random.PRNGKey(0)
    kp, kx, ke, kw = jax.random.split(root, 4)

    params = init_params(kp, NUM_FEATURES, HIDDEN_DIM)

    x = jax.random.normal(kx, (NUM_NODES, NUM_FEATURES), jnp.float32)
    edge_index = jax.random.randint(ke, (2, NUM_EDGES), 0, NUM_NODES, jnp.int32)
    edge_weight = jax.random.uniform(kw, (NUM_EDGES,), jnp.float32, 0.1, 1.0)
    # contiguous, sorted batch assignment (16 nodes per graph)
    batch = jnp.repeat(jnp.arange(NUM_GRAPHS, dtype=jnp.int32),
                       NUM_NODES // NUM_GRAPHS)

    fwd = jax.jit(functools.partial(gcn_forward, num_graphs=NUM_GRAPHS))
    out = fwd(params, x, edge_index, edge_weight, batch)
    out = jax.block_until_ready(out)
    assert out.shape == (NUM_GRAPHS,)
    assert bool(jnp.all(jnp.isfinite(out)))

    # Loose sanity check against the pure-JAX f32 reference (bf16 operands in
    # the kernel introduce a few-percent drift; catch structural errors only).
    ref = gcn_reference(params, x, edge_index, edge_weight, batch, NUM_GRAPHS)
    err = float(jnp.max(jnp.abs(out - ref)))
    scale = float(jnp.max(jnp.abs(ref))) + 1e-6
    assert err <= 0.1 * scale + 0.1, f"kernel/reference mismatch: {err} vs {scale}"

    print("KERNEL_OK")
</pallas_src>

<mosaic_0001>
module attributes {stable_mosaic.version = 11 : i64} {
  func.func private @main(%arg0: i32) attributes {dimension_semantics = [#tpu.dimension_semantics<core_parallel>], iteration_bounds = array<i64: 2>, tpu.core_type = #tpu.core_type<sc_scalar_subcore>, window_params = []} {
    return
  }
}

module attributes {stable_mosaic.version = 11 : i64} {
  func.func private @main(%arg0: i32) attributes {dimension_semantics = [#tpu.dimension_semantics<core_parallel>], iteration_bounds = array<i64: 2>, tpu.core_type = #tpu.core_type<sc_scalar_subcore>, window_params = []} {
    return
  }
}

module attributes {stable_mosaic.version = 11 : i64} {
  func.func @_gcn_fused_kernel(%arg0: i32, %arg1: i32, %arg2: memref<256x256xbf16, #tpu.memory_space<vmem>>, %arg3: memref<256x128xbf16, #tpu.memory_space<vmem>>, %arg4: memref<8x256xbf16, #tpu.memory_space<vmem>>, %arg5: memref<1x128x128xbf16, #tpu.memory_space<vmem>>, %arg6: memref<1x1x128xf32, #tpu.memory_space<vmem>>, %arg7: memref<128x128xbf16, #tpu.memory_space<vmem>>, %arg8: memref<1x128xf32, #tpu.memory_space<vmem>>, %arg9: memref<128x128xbf16, #tpu.memory_space<vmem>>, %arg10: memref<1x128xf32, #tpu.memory_space<vmem>>, %arg11: memref<8x128xf32, #tpu.memory_space<vmem>>, %arg12: memref<2x256x128xbf16, #tpu.memory_space<vmem>>) attributes {dimension_semantics = [#tpu.dimension_semantics<arbitrary>, #tpu.dimension_semantics<arbitrary>], iteration_bounds = array<i64: 5, 1>, scalar_prefetch = 0 : i64, scratch_operands = 1 : i64, tpu.core_type = #tpu.core_type<tc>, window_params = [{pipeline_mode = #tpu.pipeline_mode<synchronous>, transform_indices = @transform_0, window_bounds = array<i64: 256, 256>}, {pipeline_mode = #tpu.pipeline_mode<synchronous>, transform_indices = @transform_1, window_bounds = array<i64: 256, 128>}, {pipeline_mode = #tpu.pipeline_mode<synchronous>, transform_indices = @transform_2, window_bounds = array<i64: 8, 256>}, {transform_indices = @transform_3, window_bounds = array<i64: 1, 128, 128>}, {transform_indices = @transform_4, window_bounds = array<i64: 1, 1, 128>}, {pipeline_mode = #tpu.pipeline_mode<synchronous>, transform_indices = @transform_5, window_bounds = array<i64: 128, 128>}, {pipeline_mode = #tpu.pipeline_mode<synchronous>, transform_indices = @transform_6, window_bounds = array<i64: 1, 128>}, {pipeline_mode = #tpu.pipeline_mode<synchronous>, transform_indices = @transform_7, window_bounds = array<i64: 128, 128>}, {pipeline_mode = #tpu.pipeline_mode<synchronous>, transform_indices = @transform_8, window_bounds = array<i64: 1, 128>}, {pipeline_mode = #tpu.pipeline_mode<synchronous>, transform_indices = @transform_9, window_bounds = array<i64: 8, 128>}]} {
    %c2_i32 = arith.constant 2 : i32
    %c0_i32 = arith.constant 0 : i32
    %0 = arith.cmpi eq, %c2_i32, %c0_i32 : i32
    %c1_i32 = arith.constant 1 : i32
    %1 = arith.select %0, %c1_i32, %c2_i32 : i32
    %2 = arith.remsi %arg0, %1 : i32
    %c0_i32_0 = arith.constant 0 : i32
    %3 = arith.cmpi ne, %2, %c0_i32_0 : i32
    %c0_i32_1 = arith.constant 0 : i32
    %4 = arith.cmpi slt, %2, %c0_i32_1 : i32
    %c0_i32_2 = arith.constant 0 : i32
    %5 = arith.cmpi slt, %1, %c0_i32_2 : i32
    %6 = arith.xori %4, %5 : i1
    %7 = arith.andi %6, %3 : i1
    %8 = arith.addi %2, %1 : i32
    %9 = arith.select %7, %8, %2 : i32
    %c1_i32_3 = arith.constant 1 : i32
    %10 = arith.subi %c1_i32_3, %9 : i32
    %c0_i32_4 = arith.constant 0 : i32
    %11 = arith.cmpi eq, %arg0, %c0_i32_4 : i32
    %c0 = arith.constant 0 : index
    %c0_5 = arith.constant 0 : index
    %12 = vector.load %arg3[%c0, %c0_5] : memref<256x128xbf16, #tpu.memory_space<vmem>>, vector<256x128xbf16>
    %13 = arith.index_cast %9 : i32 to index
    %c0_6 = arith.constant 0 : index
    %c0_7 = arith.constant 0 : index
    %14 = vector.load %arg12[%13, %c0_6, %c0_7] : memref<2x256x128xbf16, #tpu.memory_space<vmem>>, vector<1x256x128xbf16>
    %15 = vector.shape_cast %14 : vector<1x256x128xbf16> to vector<256x128xbf16>
    %16 = arith.select %11, %12, %15 : vector<256x128xbf16>
    %c256_i32 = arith.constant 256 : i32
    %17 = arith.muli %arg1, %c256_i32 : i32
    %18 = tpu.assume_multiple %17, 256 : i32
    %19 = arith.index_cast %18 : i32 to index
    %c0_8 = arith.constant 0 : index
    %20 = vector.load %arg2[%19, %c0_8] : memref<256x256xbf16, #tpu.memory_space<vmem>>, vector<256x256xbf16>
    %cst = arith.constant dense<0.000000e+00> : vector<256x128xf32>
    %21 = tpu.matmul %20, %16, %cst {dimension_numbers = #tpu.dot_dimension_numbers<[1], [0], [0], [1], [0, 0, 1, 1], [], []>} : vector<256x256xbf16>, vector<256x128xbf16>, vector<256x128xf32> -> vector<256x128xf32>
    %22 = arith.truncf %21 : vector<256x128xf32> to vector<256x128xbf16>
    %c0_9 = arith.constant 0 : index
    %c0_10 = arith.constant 0 : index
    %c0_11 = arith.constant 0 : index
    %23 = vector.load %arg5[%c0_9, %c0_10, %c0_11] : memref<1x128x128xbf16, #tpu.memory_space<vmem>>, vector<1x128x128xbf16>
    %24 = vector.shape_cast %23 : vector<1x128x128xbf16> to vector<128x128xbf16>
    %cst_12 = arith.constant dense<0.000000e+00> : vector<256x128xf32>
    %25 = tpu.matmul %22, %24, %cst_12 {dimension_numbers = #tpu.dot_dimension_numbers<[1], [0], [0], [1], [0, 0, 1, 1], [], []>} : vector<256x128xbf16>, vector<128x128xbf16>, vector<256x128xf32> -> vector<256x128xf32>
    %c0_13 = arith.constant 0 : index
    %c0_14 = arith.constant 0 : index
    %c0_15 = arith.constant 0 : index
    %26 = vector.load %arg6[%c0_13, %c0_14, %c0_15] : memref<1x1x128xf32, #tpu.memory_space<vmem>>, vector<1x1x128xf32>
    %27 = vector.shape_cast %26 : vector<1x1x128xf32> to vector<1x128xf32>
    %28 = vector.broadcast %27 : vector<1x128xf32> to vector<256x128xf32>
    %29 = arith.addf %25, %28 : vector<256x128xf32>
    %c4_i32 = arith.constant 4 : i32
    %30 = arith.cmpi slt, %arg0, %c4_i32 : i32
    %cst_16 = arith.constant 0.000000e+00 : f32
    %31 = vector.broadcast %cst_16 : f32 to vector<256x128xf32>
    %32 = arith.maximumf %29, %31 : vector<256x128xf32>
    %33 = arith.select %30, %32, %29 : vector<256x128xf32>
    %34 = arith.truncf %33 : vector<256x128xf32> to vector<256x128xbf16>
    %35 = arith.index_cast %10 : i32 to index
    %36 = arith.index_cast %18 : i32 to index
    %c0_17 = arith.constant 0 : index
    %37 = vector.load %arg12[%35, %36, %c0_17] : memref<2x256x128xbf16, #tpu.memory_space<vmem>>, vector<1x256x128xbf16>
    %38 = vector.shape_cast %37 : vector<1x256x128xbf16> to vector<256x128xbf16>
    %39 = vector.shape_cast %34 : vector<256x128xbf16> to vector<1x256x128xbf16>
    tpu.vector_store %arg12[%35, %36, %c0_17], %39 {strides = array<i32>} : memref<2x256x128xbf16, #tpu.memory_space<vmem>>, vector<1x256x128xbf16>,
    %c4_i32_18 = arith.constant 4 : i32
    %40 = arith.cmpi eq, %arg0, %c4_i32_18 : i32
    %c0_i32_19 = arith.constant 0 : i32
    %41 = arith.cmpi eq, %arg1, %c0_i32_19 : i32
    %42 = arith.andi %40, %41 : i1
    %43 = arith.extui %42 : i1 to i32
    %c0_i32_20 = arith.constant 0 : i32
    %44 = arith.cmpi ne, %43, %c0_i32_20 : i32
    scf.if %44 {
      %c0_21 = arith.constant 0 : index
      %c0_22 = arith.constant 0 : index
      %45 = vector.load %arg4[%c0_21, %c0_22] : memref<8x256xbf16, #tpu.memory_space<vmem>>, vector<8x256xbf16>
      %46 = arith.index_cast %10 : i32 to index
      %c0_23 = arith.constant 0 : index
      %c0_24 = arith.constant 0 : index
      %47 = vector.load %arg12[%46, %c0_23, %c0_24] : memref<2x256x128xbf16, #tpu.memory_space<vmem>>, vector<1x256x128xbf16>
      %48 = vector.shape_cast %47 : vector<1x256x128xbf16> to vector<256x128xbf16>
      %cst_25 = arith.constant dense<0.000000e+00> : vector<8x128xf32>
      %49 = tpu.matmul %45, %48, %cst_25 {dimension_numbers = #tpu.dot_dimension_numbers<[1], [0], [0], [1], [0, 0, 1, 1], [], []>} : vector<8x256xbf16>, vector<256x128xbf16>, vector<8x128xf32> -> vector<8x128xf32>
      %cst_26 = arith.constant 0.000000e+00 : f32
      %50 = vector.broadcast %cst_26 : f32 to vector<8x128xf32>
      %51 = arith.maximumf %49, %50 : vector<8x128xf32>
      %52 = arith.truncf %51 : vector<8x128xf32> to vector<8x128xbf16>
      %c0_27 = arith.constant 0 : index
      %c0_28 = arith.constant 0 : index
      %53 = vector.load %arg7[%c0_27, %c0_28] : memref<128x128xbf16, #tpu.memory_space<vmem>>, vector<128x128xbf16>
      %cst_29 = arith.constant dense<0.000000e+00> : vector<8x128xf32>
      %54 = tpu.matmul %52, %53, %cst_29 {dimension_numbers = #tpu.dot_dimension_numbers<[1], [0], [0], [1], [0, 0, 1, 1], [], []>} : vector<8x128xbf16>, vector<128x128xbf16>, vector<8x128xf32> -> vector<8x128xf32>
      %c0_30 = arith.constant 0 : index
      %c0_31 = arith.constant 0 : index
      %55 = vector.load %arg8[%c0_30, %c0_31] : memref<1x128xf32, #tpu.memory_space<vmem>>, vector<1x128xf32>
      %56 = vector.broadcast %55 : vector<1x128xf32> to vector<8x128xf32>
      %57 = arith.addf %54, %56 : vector<8x128xf32>
      %cst_32 = arith.constant 0.000000e+00 : f32
      %58 = vector.broadcast %cst_32 : f32 to vector<8x128xf32>
      %59 = arith.maximumf %57, %58 : vector<8x128xf32>
      %60 = arith.truncf %59 : vector<8x128xf32> to vector<8x128xbf16>
      %c0_33 = arith.constant 0 : index
      %c0_34 = arith.constant 0 : index
      %61 = vector.load %arg9[%c0_33, %c0_34] : memref<128x128xbf16, #tpu.memory_space<vmem>>, vector<128x128xbf16>
      %cst_35 = arith.constant dense<0.000000e+00> : vector<8x128xf32>
      %62 = tpu.matmul %60, %61, %cst_35 {dimension_numbers = #tpu.dot_dimension_numbers<[1], [0], [0], [1], [0, 0, 1, 1], [], []>} : vector<8x128xbf16>, vector<128x128xbf16>, vector<8x128xf32> -> vector<8x128xf32>
      %c0_36 = arith.constant 0 : index
      %c0_37 = arith.constant 0 : index
      %63 = vector.load %arg10[%c0_36, %c0_37] : memref<1x128xf32, #tpu.memory_space<vmem>>, vector<1x128xf32>
      %64 = vector.broadcast %63 : vector<1x128xf32> to vector<8x128xf32>
      %65 = arith.addf %62, %64 : vector<8x128xf32>
      %c0_38 = arith.constant 0 : index
      %c0_39 = arith.constant 0 : index
      %66 = vector.load %arg11[%c0_38, %c0_39] : memref<8x128xf32, #tpu.memory_space<vmem>>, vector<8x128xf32>
      tpu.vector_store %arg11[%c0_38, %c0_39], %65 {strides = array<i32>} : memref<8x128xf32, #tpu.memory_space<vmem>>, vector<8x128xf32>,
    } else {
    }
    return
  }
  func.func @transform_0(%arg0: i32, %arg1: i32) -> (i32, i32) {
    %c0_i32 = arith.constant 0 : i32
    %c0_i32_0 = arith.constant 0 : i32
    %c0_i32_1 = arith.constant 0 : i32
    return %c0_i32, %c0_i32_0 : i32, i32
  }
  func.func @transform_1(%arg0: i32, %arg1: i32) -> (i32, i32) {
    %c0_i32 = arith.constant 0 : i32
    %c0_i32_0 = arith.constant 0 : i32
    %c0_i32_1 = arith.constant 0 : i32
    return %c0_i32, %c0_i32_0 : i32, i32
  }
  func.func @transform_2(%arg0: i32, %arg1: i32) -> (i32, i32) {
    %c0_i32 = arith.constant 0 : i32
    %c0_i32_0 = arith.constant 0 : i32
    %c0_i32_1 = arith.constant 0 : i32
    return %c0_i32, %c0_i32_0 : i32, i32
  }
  func.func @transform_3(%arg0: i32, %arg1: i32) -> (i32, i32, i32) {
    %c0_i32 = arith.constant 0 : i32
    %c0_i32_0 = arith.constant 0 : i32
    %c0_i32_1 = arith.constant 0 : i32
    return %arg0, %c0_i32, %c0_i32_0 : i32, i32, i32
  }
  func.func @transform_4(%arg0: i32, %arg1: i32) -> (i32, i32, i32) {
    %c0_i32 = arith.constant 0 : i32
    %c0_i32_0 = arith.constant 0 : i32
    %c0_i32_1 = arith.constant 0 : i32
    return %arg0, %c0_i32, %c0_i32_0 : i32, i32, i32
  }
  func.func @transform_5(%arg0: i32, %arg1: i32) -> (i32, i32) {
    %c0_i32 = arith.constant 0 : i32
    %c0_i32_0 = arith.constant 0 : i32
    %c0_i32_1 = arith.constant 0 : i32
    return %c0_i32, %c0_i32_0 : i32, i32
  }
  func.func @transform_6(%arg0: i32, %arg1: i32) -> (i32, i32) {
    %c0_i32 = arith.constant 0 : i32
    %c0_i32_0 = arith.constant 0 : i32
    %c0_i32_1 = arith.constant 0 : i32
    return %c0_i32, %c0_i32_0 : i32, i32
  }
  func.func @transform_7(%arg0: i32, %arg1: i32) -> (i32, i32) {
    %c0_i32 = arith.constant 0 : i32
    %c0_i32_0 = arith.constant 0 : i32
    %c0_i32_1 = arith.constant 0 : i32
    return %c0_i32, %c0_i32_0 : i32, i32
  }
  func.func @transform_8(%arg0: i32, %arg1: i32) -> (i32, i32) {
    %c0_i32 = arith.constant 0 : i32
    %c0_i32_0 = arith.constant 0 : i32
    %c0_i32_1 = arith.constant 0 : i32
    return %c0_i32, %c0_i32_0 : i32, i32
  }
  func.func @transform_9(%arg0: i32, %arg1: i32) -> (i32, i32) {
    %c0_i32 = arith.constant 0 : i32
    %c0_i32_0 = arith.constant 0 : i32
    %c0_i32_1 = arith.constant 0 : i32
    return %c0_i32, %c0_i32_0 : i32, i32
  }
}

</mosaic_0001>

<bundles_post_ra>
// kernel: gcn_forward.1
= control target key start
LH: loop header
LB: loop body
LE: loop exit
PB: predicated region body
PF: predicated region fallthrough
CT: control target
= control target key end

     0   :  { %s2608_s30 = smov 0   ;;  %s2610_s10 = smov 0   ;;  %s3182_s0 = inlined_call_operand.vmem [shape: bf16[256,256], index: 0, kind: input, shape index: {}]   ;;  %s3183_s1 = inlined_call_operand.vmem [shape: bf16[256,128], index: 1, kind: input, shape index: {}]   ;;  %s3184_s2 = inlined_call_operand.vmem [shape: bf16[8,256], index: 2, kind: input, shape index: {}]   ;;  %s3185_s3 = inlined_call_operand.vmem [shape: bf16[5,128,128], index: 3, kind: input, shape index: {}]   ;;  %s3186_s4 = inlined_call_operand.vmem [shape: f32[5,1,128], index: 4, kind: input, shape index: {}]   ;;  %s3187_s5 = inlined_call_operand.vmem [shape: bf16[128,128], index: 5, kind: input, shape index: {}]   ;;  %s3188_s6 = inlined_call_operand.vmem [shape: f32[1,128], index: 6, kind: input, shape index: {}]   ;;  %s3189_s7 = inlined_call_operand.vmem [shape: bf16[128,128], index: 7, kind: input, shape index: {}]   ;;  %s3190_s8 = inlined_call_operand.vmem [shape: f32[1,128], index: 8, kind: input, shape index: {}]   ;;  %s3191_s9 = inlined_call_operand.vmem [shape: f32[8,128], index: 9, kind: output, shape index: {}]  }
   0x1   :  { %s2612_s11 = smov 0  }
   0x2 LB: > { %s31_s12 = sadd.s32 1, %s2550_s10  ;;  %p1865_p0 = scmp.ge.s32.totalorder %s2554_s11, 1  ;;  %s2554_s11 = sphi %s2612_s11, %s19_s11   ;;  %s2550_s10 = sphi %s2610_s10, %s3197_s10   ;;  %s2546_s30 = sphi %s2608_s30, %s3196_s30  }
   0x3   : > { %p33_p1 = scmp.ge.s32.totalorder %s31_s12, 5  ;;  %p302_p2 = scmp.lt.s32.totalorder %s2554_s11, 6 }
   0x5   : > { %s3199_s12 = smov (%p33_p1, %s31_s12), 0  ;;  %p303_p3 = pnand %p1865_p0, %p302_p2 }
   0x6   : > { %p345_p4 = scmp.lt.s32.totalorder (!%p303_p3), %s2546_s30, 0  ;;  %s346_s13 = ssub.s32 (!%p303_p3), 0, %s2546_s30 }
   0x7   : > { %306 = sbr.rel (%p303_p3) target bundleno = 1205 (0x4b5), region = 56  ;;  %s1868_s14 = smin.u32 (!%p303_p3), %s2546_s30, %s346_s13 }
   0x8   : > { %p358_p5 = scmp.eq.s32.totalorder (!%p303_p3), %s2546_s30, 0  ;;  %s348_s15 = sand.u32 (!%p303_p3), 1, %s1868_s14  }
   0x9   : > { %s349_s16 = ssub.s32 (!%p303_p3), 0, %s348_s15  ;;  %p336_p7 = scmp.lt.s32.totalorder (!%p303_p3), %s2546_s30, 4 }
   0xa   : > { %p1396_p8 = scmp.eq.s32.totalorder (!%p303_p3), %s2546_s30, 4 }
   0xc   : > { %s3201_s16 = smov (!%p345_p4, %s349_s16), %s348_s15  ;;  %v389_v1 = vld [vmem:[%s3183_s1 + $0x78] sm:$0xf]  ;;  %v390_v2 = vld [vmem:[%s3183_s1 + $0x7c] sm:$0xf]  ;;  %v387_v5 = vld [vmem:[%s3183_s1 + $0x70] sm:$0xf] }
   0xd   : > { %s426_s17 = scalar_select %p358_p5, 1, 0  ;;  %v373_v3 = vld [vmem:[%s3183_s1 + $0x38] sm:$0xf]  ;;  %v374_v4 = vld [vmem:[%s3183_s1 + $0x3c] sm:$0xf] }
   0xe   : > { %p1870_p6 = scmp.lt.s32.totalorder %s3201_s16, 0  ;;  %s355_s18 = sadd.s32 2, %s3201_s16  ;;  %v388_v6 = vld [vmem:[%s3183_s1 + $0x74] sm:$0xf]  ;;  %v371_v8 = vld [vmem:[%s3183_s1 + $0x30] sm:$0xf] }
   0xf   : > { %v427_v0 = vstv %s426_s17  ;;  %v372_v9 = vld [vmem:[%s3183_s1 + $0x34] sm:$0xf]  ;;  %v385_v10 = vld [vmem:[%s3183_s1 + $0x68] sm:$0xf]  ;;  %v386_v11 = vld [vmem:[%s3183_s1 + $0x6c] sm:$0xf] }
  0x10   : > { %s3203_s18 = smov (!%p1870_p6, %s355_s18), %s3201_s16  ;;  %vm2653_vm0 = vcmp.eq.s32.totalorder %v427_v0, 1  ;;  %v369_v21 = vld [vmem:[%s3183_s1 + $0x28] sm:$0xf]  ;;  %v370_v22 = vld [vmem:[%s3183_s1 + $0x2c] sm:$0xf]  ;;  %vm2557_vm2 = vmmov (%p1396_p8), 0  }
  0x11   : > { %s2005_s14 = sshll.u32 %s3203_s18, 7  ;;  %v383_v30 = vld [vmem:[%s3183_s1 + $0x60] sm:$0xf]  ;;  %v384_v40 = vld [vmem:[%s3183_s1 + $0x64] sm:$0xf]  ;;  %s357_s23 = ssub.s32 1, %s3203_s18 }
  0x12   : > { %s2669_s24 = scalar_lea.vmem [#allocation2], %s2005_s14  ;;  %v367_v47 = vld [vmem:[%s3183_s1 + $0x20] sm:$0xf]  ;;  %v368_v48 = vld [vmem:[%s3183_s1 + $0x24] sm:$0xf] }
  0x13   : > { %v424_v12 = vld [vmem:[%s2669_s24 + $0x78] sm:$0xf]  ;;  %v425_v13 = vld [vmem:[%s2669_s24 + $0x7c] sm:$0xf]  ;;  %v422_v19 = vld [vmem:[%s2669_s24 + $0x70] sm:$0xf] }
  0x14   : > { %v408_v14 = vld [vmem:[%s2669_s24 + $0x38] sm:$0xf]  ;;  %v459_v15 = vsel %vm2653_vm0, %v389_v1, %v424_v12  ;;  %v460_v16 = vsel %vm2653_vm0, %v390_v2, %v425_v13  ;;  %v409_v17 = vld [vmem:[%s2669_s24 + $0x3c] sm:$0xf]  ;;  %v423_v20 = vld [vmem:[%s2669_s24 + $0x74] sm:$0xf]  ;;  %v457_v25 = vsel %vm2653_vm0, %v387_v5, %v422_v19 }
  0x15   : > { %v443_v18 = vsel %vm2653_vm0, %v373_v3, %v408_v14  ;;  %v1920_v23 = vcombine.low %v459_v15, %v460_v16  ;;  %v444_v24 = vsel %vm2653_vm0, %v374_v4, %v409_v17  ;;  %v458_v26 = vsel %vm2653_vm0, %v388_v6, %v423_v20  ;;  %v406_v27 = vld [vmem:[%s2669_s24 + $0x30] sm:$0xf]  ;;  %v407_v28 = vld [vmem:[%s2669_s24 + $0x34] sm:$0xf]  ;;  %v420_v29 = vld [vmem:[%s2669_s24 + $0x68] sm:$0xf] }
  0x16   : > { %v1912_v31 = vcombine.low %v443_v18, %v444_v24  ;;  %v1919_v32 = vcombine.low %v457_v25, %v458_v26  ;;  %v441_v33 = vsel %vm2653_vm0, %v371_v8, %v406_v27  ;;  %v442_v34 = vsel %vm2653_vm0, %v372_v9, %v407_v28  ;;  %v421_v35 = vld [vmem:[%s2669_s24 + $0x6c] sm:$0xf]  ;;  %v404_v36 = vld [vmem:[%s2669_s24 + $0x28] sm:$0xf]  ;;  %v418_v41 = vld [vmem:[%s2669_s24 + $0x60] sm:$0xf] }
  0x17   : > { %v405_v37 = vld [vmem:[%s2669_s24 + $0x2c] sm:$0xf]  ;;  %2136 = vmatprep.subr.bf16.mxu0 %v1920_v23  ;;  %v455_v38 = vsel %vm2653_vm0, %v385_v10, %v420_v29  ;;  %v456_v39 = vsel %vm2653_vm0, %v386_v11, %v421_v35  ;;  %v419_v42 = vld [vmem:[%s2669_s24 + $0x64] sm:$0xf]  ;;  %v1911_v43 = vcombine.low %v441_v33, %v442_v34  ;;  %v439_v45 = vsel %vm2653_vm0, %v369_v21, %v404_v36  ;;  %v402_v51 = vld [vmem:[%s2669_s24 + $0x20] sm:$0xf] }
  0x18   : > { %2137 = vmatpush3.bf16.msra.mxu0 %v1912_v31  ;;  %v1918_v44 = vcombine.low %v455_v38, %v456_v39  ;;  %v440_v46 = vsel %vm2653_vm0, %v370_v22, %v405_v37  ;;  %v453_v49 = vsel %vm2653_vm0, %v383_v30, %v418_v41  ;;  %v454_v50 = vsel %vm2653_vm0, %v384_v40, %v419_v42  ;;  %v403_v52 = vld [vmem:[%s2669_s24 + $0x24] sm:$0xf]  ;;  %v381_v53 = vld [vmem:[%s3183_s1 + $0x58] sm:$0xf]  ;;  %v382_v54 = vld [vmem:[%s3183_s1 + $0x5c] sm:$0xf] }
  0x19   : > { %2138 = vmatprep.subr.bf16.mxu0 %v1919_v32  ;;  %2400 = vmatprep.subr.bf16.mxu1 %v1920_v23  ;;  %v416_v55 = vld [vmem:[%s2669_s24 + $0x58] sm:$0xf]  ;;  %v417_v56 = vld [vmem:[%s2669_s24 + $0x5c] sm:$0xf]  ;;  %v1910_v57 = vcombine.low %v439_v45, %v440_v46  ;;  %v1917_v58 = vcombine.low %v453_v49, %v454_v50  ;;  %v437_v59 = vsel %vm2653_vm0, %v367_v47, %v402_v51  ;;  %v379_v63 = vld [vmem:[%s3183_s1 + $0x50] sm:$0xf] }
  0x1a   : > { %2408 = vmatpush3.bf16.msra.mxu1 %v1912_v31  ;;  %v438_v60 = vsel %vm2653_vm0, %v368_v48, %v403_v52  ;;  %v365_v61 = vld [vmem:[%s3183_s1 + $0x18] sm:$0xf]  ;;  %v366_v62 = vld [vmem:[%s3183_s1 + $0x1c] sm:$0xf]  ;;  %v451_v0 = vsel %vm2653_vm0, %v381_v53, %v416_v55  ;;  %v452_v1 = vsel %vm2653_vm0, %v382_v54, %v417_v56  ;;  %v380_v4 = vld [vmem:[%s3183_s1 + $0x54] sm:$0xf] }
  0x1b   : > { %v400_v2 = vld [vmem:[%s2669_s24 + $0x18] sm:$0xf]  ;;  %v401_v3 = vld [vmem:[%s2669_s24 + $0x1c] sm:$0xf]  ;;  %2401 = vmatprep.subr.bf16.mxu1 %v1919_v32  ;;  %v414_v5 = vld [vmem:[%s2669_s24 + $0x50] sm:$0xf]  ;;  %v1909_v9 = vcombine.low %v437_v59, %v438_v60  ;;  %v1916_v12 = vcombine.low %v451_v0, %v452_v1 }
  0x1c   : > { %2139 = vmatpush3.bf16.msra.mxu0 %v1911_v43  ;;  %v415_v6 = vld [vmem:[%s2669_s24 + $0x54] sm:$0xf]  ;;  %v2444_v8 = vld [vmem:[%s3182_s0 + $0x4] ss:$8 sps:$4 sm:$0xff]   ;;  %v363_v10 = vld [vmem:[%s3183_s1 + $0x10] sm:$0xf]  ;;  %v435_v13 = vsel %vm2653_vm0, %v365_v61, %v400_v2  ;;  %v436_v14 = vsel %vm2653_vm0, %v366_v62, %v401_v3  ;;  %v449_v17 = vsel %vm2653_vm0, %v379_v63, %v414_v5 }
  0x1d   : > { %2140 = vmatprep.subr.bf16.mxu0 %v1918_v44  ;;  %v364_v11 = vld [vmem:[%s3183_s1 + $0x14] sm:$0xf]  ;;  %v377_v15 = vld [vmem:[%s3183_s1 + $0x48] sm:$0xf]  ;;  %v378_v16 = vld [vmem:[%s3183_s1 + $0x4c] sm:$0xf]  ;;  %787 = vmatprep.mubr.bf16.mxu0 %v2444_v8  ;;  %v450_v18 = vsel %vm2653_vm0, %v380_v4, %v415_v6  ;;  %v1908_v23 = vcombine.low %v435_v13, %v436_v14 }
  0x1e   : > { %2409 = vmatpush3.bf16.msra.mxu1 %v1911_v43  ;;  %v398_v19 = vld [vmem:[%s2669_s24 + $0x10] sm:$0xf]  ;;  %v399_v20 = vld [vmem:[%s2669_s24 + $0x14] sm:$0xf]  ;;  %v412_v21 = vld [vmem:[%s2669_s24 + $0x48] sm:$0xf]  ;;  %v1915_v27 = vcombine.low %v449_v17, %v450_v18 }
  0x1f   : > { %2402 = vmatprep.subr.bf16.mxu1 %v1918_v44  ;;  %v413_v22 = vld [vmem:[%s2669_s24 + $0x4c] sm:$0xf]  ;;  %v361_v24 = vld [vmem:[%s3183_s1 + $0x8] sm:$0xf]  ;;  %v433_v28 = vsel %vm2653_vm0, %v363_v10, %v398_v19  ;;  %v434_v29 = vsel %vm2653_vm0, %v364_v11, %v399_v20  ;;  %v447_v31 = vsel %vm2653_vm0, %v377_v15, %v412_v21  ;;  %v375_v33 = vld [vmem:[%s3183_s1 + $0x40] sm:$0xf] }
  0x20   : > { %2141 = vmatpush3.bf16.msra.mxu0 %v1910_v57  ;;  %v362_v25 = vld [vmem:[%s3183_s1 + $0xc] sm:$0xf]  ;;  %v396_v26 = vld [vmem:[%s2669_s24 + $0x8] sm:$0xf]  ;;  %v448_v32 = vsel %vm2653_vm0, %v378_v16, %v413_v22  ;;  %v376_v34 = vld [vmem:[%s3183_s1 + $0x44] sm:$0xf]  ;;  %v1907_v37 = vcombine.low %v433_v28, %v434_v29 }
  0x21   : > { %2142 = vmatprep.subr.bf16.mxu0 %v1917_v58  ;;  %v397_v30 = vld [vmem:[%s2669_s24 + $0xc] sm:$0xf]  ;;  %v410_v35 = vld [vmem:[%s2669_s24 + $0x40] sm:$0xf]  ;;  %v411_v36 = vld [vmem:[%s2669_s24 + $0x44] sm:$0xf]  ;;  %v1914_v39 = vcombine.low %v447_v31, %v448_v32  ;;  %v431_v40 = vsel %vm2653_vm0, %v361_v24, %v396_v26 }
  0x22   : > { %2410 = vmatpush3.bf16.msra.mxu1 %v1910_v57  ;;  %v359_v38 = vld [vmem:[%s3183_s1] sm:$0xf]  ;;  %v432_v41 = vsel %vm2653_vm0, %v362_v25, %v397_v30  ;;  %v360_v42 = vld [vmem:[%s3183_s1 + $0x4] sm:$0xf]  ;;  %v445_v43 = vsel %vm2653_vm0, %v375_v33, %v410_v35  ;;  %v446_v44 = vsel %vm2653_vm0, %v376_v34, %v411_v36  ;;  %s2836_s26 = scalar_select %p336_p7, %s2546_s30, 4 }
  0x23   : > { %2403 = vmatprep.subr.bf16.mxu1 %v1917_v58  ;;  %v394_v45 = vld [vmem:[%s2669_s24] sm:$0xf]  ;;  %v395_v46 = vld [vmem:[%s2669_s24 + $0x4] sm:$0xf]  ;;  %v1906_v48 = vcombine.low %v431_v40, %v432_v41  ;;  %v1913_v49 = vcombine.low %v445_v43, %v446_v44  ;;  %v2445_v7 = vld [vmem:[%s3182_s0 + $0x14] ss:$8 sps:$4 sm:$0xff]  }
  0x24   : > { %2143 = vmatpush3.bf16.msra.mxu0 %v1909_v9  ;;  %v2474_v47 = vld [vmem:[%s3182_s0 + $0xc4] ss:$8 sps:$4 sm:$0xff]   ;;  %v429_v50 = vsel %vm2653_vm0, %v359_v38, %v394_v45  ;;  %v430_v51 = vsel %vm2653_vm0, %v360_v42, %v395_v46  ;;  %s2004_s24 = sshll.u32 %s2836_s26, 6  ;;  %v2442_v53 = vld [vmem:[%s3182_s0] ss:$8 sps:$4 sm:$0xff]   ;;  %s343_s21 = scalar_lea.vmem %s3186_s4, %s2836_s26 }
  0x25   : > { %2144 = vmatprep.subr.bf16.mxu0 %v1916_v12  ;;  %883 = vmatprep.mubr.bf16.mxu1 %v2474_v47  ;;  %v1905_v52 = vcombine.low %v429_v50, %v430_v51  ;;  %s2849_s14 = scalar_lea.vmem %s3185_s3, %s2004_s24  ;;  %v2472_v54 = vld [vmem:[%s3182_s0 + $0xc0] ss:$8 sps:$4 sm:$0xff]   ;;  %v2478_v56 = vld [vmem:[%s3182_s0 + $0xd4] ss:$8 sps:$4 sm:$0xff]   ;;  %v2447_v58 = vld [vmem:[%s3182_s0 + $0x10] ss:$8 sps:$4 sm:$0xff]  }
  0x26   : > { %2411 = vmatpush3.bf16.msra.mxu1 %v1909_v9  ;;  %v2490_v55 = vld [vmem:[%s2849_s14 + $0x38] sm:$0xff]   ;;  %v2491_v57 = vld [vmem:[%s2849_s14 + $0x30] sm:$0xff]   ;;  %v2448_v59 = vld [vmem:[%s3182_s0 + $0x24] ss:$8 sps:$4 sm:$0xff]   ;;  %s1197_s22 = scalar_select %p336_p7, 1, 0 }
  0x27   : > { %2404 = vmatprep.subr.bf16.mxu1 %v1916_v12  ;;  %v2492_v60 = vld [vmem:[%s2849_s14 + $0x28] sm:$0xff]   ;;  %v2480_v61 = vld [vmem:[%s3182_s0 + $0xd0] ss:$8 sps:$4 sm:$0xff]   ;;  %v2493_v63 = vld [vmem:[%s2849_s14 + $0x20] sm:$0xff]   ;;  %s2038_s26 = sshll.u32 %s357_s23, 7 }
  0x28   : > { %2145 = vmatpush3.bf16.msra.mxu0 %v1908_v23  ;;  %v2484_v62 = vld [vmem:[%s3182_s0 + $0xe4] ss:$8 sps:$4 sm:$0xff]   ;;  %v2450_v0 = vld [vmem:[%s3182_s0 + $0x20] ss:$8 sps:$4 sm:$0xff]   ;;  %v2451_v1 = vld [vmem:[%s3182_s0 + $0x34] ss:$8 sps:$4 sm:$0xff]  }
  0x29   : > { %2146 = vmatprep.subr.bf16.mxu0 %v1915_v27  ;;  %v2486_v2 = vld [vmem:[%s3182_s0 + $0xe0] ss:$8 sps:$4 sm:$0xff]   ;;  %v2487_v3 = vld [vmem:[%s3182_s0 + $0xf4] ss:$8 sps:$4 sm:$0xff]   ;;  %v2453_v4 = vld [vmem:[%s3182_s0 + $0x30] ss:$8 sps:$4 sm:$0xff]  }
  0x2a   : > { %2412 = vmatpush3.bf16.msra.mxu1 %v1908_v23  ;;  %v2454_v5 = vld [vmem:[%s3182_s0 + $0x44] ss:$8 sps:$4 sm:$0xff]   ;;  %v2489_v6 = vld [vmem:[%s3182_s0 + $0xf0] ss:$8 sps:$4 sm:$0xff]   ;;  %v2456_v8 = vld [vmem:[%s3182_s0 + $0x40] ss:$8 sps:$4 sm:$0xff]  }
  0x2b   : > { %2405 = vmatprep.subr.bf16.mxu1 %v1915_v27  ;;  %v2457_v9 = vld [vmem:[%s3182_s0 + $0x54] ss:$8 sps:$4 sm:$0xff]   ;;  %v2459_v10 = vld [vmem:[%s3182_s0 + $0x50] ss:$8 sps:$4 sm:$0xff]   ;;  %v2460_v11 = vld [vmem:[%s3182_s0 + $0x64] ss:$8 sps:$4 sm:$0xff]  }
  0x2c   : > { %2147 = vmatpush3.bf16.msra.mxu0 %v1907_v37  ;;  %v2462_v12 = vld [vmem:[%s3182_s0 + $0x60] ss:$8 sps:$4 sm:$0xff]   ;;  %v2463_v13 = vld [vmem:[%s3182_s0 + $0x74] ss:$8 sps:$4 sm:$0xff]   ;;  %v2465_v14 = vld [vmem:[%s3182_s0 + $0x70] ss:$8 sps:$4 sm:$0xff]  }
  0x2d   : > { %2148 = vmatprep.subr.bf16.mxu0 %v1914_v39  ;;  %v2466_v15 = vld [vmem:[%s3182_s0 + $0x84] ss:$8 sps:$4 sm:$0xff]   ;;  %v2468_v16 = vld [vmem:[%s3182_s0 + $0x80] ss:$8 sps:$4 sm:$0xff]   ;;  %v2469_v17 = vld [vmem:[%s3182_s0 + $0x94] ss:$8 sps:$4 sm:$0xff]  }
  0x2e   : > { %2413 = vmatpush3.bf16.msra.mxu1 %v1907_v37  ;;  %v2494_v18 = vld [vmem:[%s2849_s14 + $0x18] sm:$0xff]   ;;  %v2475_v20 = vld [vmem:[%s3182_s0 + $0xa4] ss:$8 sps:$4 sm:$0xff]   ;;  %v2495_v21 = vld [vmem:[%s2849_s14 + $0x10] sm:$0xff]   ;;  %s2975_s18 = scalar_lea.vmem [#allocation2], %s2038_s26 }
  0x2f   : > { %2406 = vmatprep.subr.bf16.mxu1 %v1914_v39  ;;  %v2471_v19 = vld [vmem:[%s3182_s0 + $0x90] ss:$8 sps:$4 sm:$0xff]   ;;  %v2496_v22 = vld [vmem:[%s2849_s14 + $0x8] sm:$0xff]   ;;  %v2481_v24 = vld [vmem:[%s3182_s0 + $0xb4] ss:$8 sps:$4 sm:$0xff]  }
  0x30   : > { %2149 = vmatpush3.bf16.msra.mxu0 %v1906_v48  ;;  %v2477_v23 = vld [vmem:[%s3182_s0 + $0xa0] ss:$8 sps:$4 sm:$0xff]   ;;  %v2483_v26 = vld [vmem:[%s3182_s0 + $0xb0] ss:$8 sps:$4 sm:$0xff]  }
  0x31   : > { %2150 = vmatprep.subr.bf16.mxu0 %v1913_v49  ;;  %v2497_v25 = vld [vmem:[%s2849_s14] sm:$0xff]  }
  0x32   : > { %2414 = vmatpush3.bf16.msra.mxu1 %v1906_v48 }
  0x33   : > { %2407 = vmatprep.subr.bf16.mxu1 %v1913_v49 }
  0x34   : > { %2151 = vmatpush3.bf16.msra.mxu0 %v1905_v52 }
  0x36   : > { %2415 = vmatpush3.bf16.msra.mxu1 %v1905_v52 }
  0x37   : > { %788 = vmatmul.mubr.bf16.vlgmr.msra.gmra.mxu0 %v2442_v53  ;;  %2312 = vmatprep.subr.bf16.mxu1 %v2490_v55 }
  0x38   : > { %795 = vmatprep.mubr.bf16.mxu0 %v2445_v7 }
  0x39   : > { %884 = vmatmul.mubr.bf16.vlgmr.msra.gmra.mxu1 %v2472_v54 }
  0x3a   : > { %891 = vmatprep.mubr.bf16.mxu1 %v2478_v56  ;;  %2313 = vmatpush3.bf16.msra.mxu1 %v2490_v55 }
  0x3b   : > { %2314 = vmatprep.subr.bf16.mxu1 %v2491_v57 }
  0x3e   : > { %2315 = vmatpush3.bf16.msra.mxu1 %v2491_v57 }
  0x3f   : > { %796 = vmatmul.mubr.bf16.gmra.mxu0 %v2447_v58  ;;  %2316 = vmatprep.subr.bf16.mxu1 %v2492_v60 }
  0x40   : > { %803 = vmatprep.mubr.bf16.mxu0 %v2448_v59 }
  0x41   : > { %892 = vmatmul.mubr.bf16.gmra.mxu1 %v2480_v61 }
  0x42   : > { %899 = vmatprep.mubr.bf16.mxu1 %v2484_v62  ;;  %2317 = vmatpush3.bf16.msra.mxu1 %v2492_v60 }
  0x43   : > { %2318 = vmatprep.subr.bf16.mxu1 %v2493_v63 }
  0x46   : > { %2319 = vmatpush3.bf16.msra.mxu1 %v2493_v63 }
  0x47   : > { %804 = vmatmul.mubr.bf16.gmra.mxu0 %v2450_v0  ;;  %2320 = vmatprep.subr.bf16.mxu1 %v2494_v18 }
  0x48   : > { %811 = vmatprep.mubr.bf16.mxu0 %v2451_v1 }
  0x49   : > { %900 = vmatmul.mubr.bf16.gmra.mxu1 %v2486_v2 }
  0x4a   : > { %907 = vmatprep.mubr.bf16.mxu1 %v2487_v3  ;;  %2321 = vmatpush3.bf16.msra.mxu1 %v2494_v18 }
  0x4b   : > { %2322 = vmatprep.subr.bf16.mxu1 %v2495_v21 }
  0x4e   : > { %2323 = vmatpush3.bf16.msra.mxu1 %v2495_v21 }
  0x4f   : > { %812 = vmatmul.mubr.bf16.gmra.mxu0 %v2453_v4  ;;  %2324 = vmatprep.subr.bf16.mxu1 %v2496_v22 }
  0x50   : > { %819 = vmatprep.mubr.bf16.mxu0 %v2454_v5 }
  0x51   : > { %908 = vmatmul.mubr.bf16.gmra.mxu1 %v2489_v6 }
  0x52   : > { %2325 = vmatpush3.bf16.msra.mxu1 %v2496_v22 }
  0x53   : > { %2326 = vmatprep.subr.bf16.mxu1 %v2497_v25 }
  0x56   : > { %2327 = vmatpush3.bf16.msra.mxu1 %v2497_v25 }
  0x57   : > { %820 = vmatmul.mubr.bf16.gmra.mxu0 %v2456_v8 }
  0x58   : > { %827 = vmatprep.mubr.bf16.mxu0 %v2457_v9 }
  0x5f   : > { %828 = vmatmul.mubr.bf16.gmra.mxu0 %v2459_v10 }
  0x60   : > { %835 = vmatprep.mubr.bf16.mxu0 %v2460_v11 }
  0x67   : > { %836 = vmatmul.mubr.bf16.gmra.mxu0 %v2462_v12 }
  0x68   : > { %843 = vmatprep.mubr.bf16.mxu0 %v2463_v13 }
  0x6f   : > { %844 = vmatmul.mubr.bf16.gmra.mxu0 %v2465_v14 }
  0x70   : > { %851 = vmatprep.mubr.bf16.mxu0 %v2466_v15 }
  0x77   : > { %852 = vmatmul.mubr.bf16.gmra.mxu0 %v2468_v16 }
  0x78   : > { %859 = vmatprep.mubr.bf16.mxu0 %v2469_v17 }
  0x7f   : > { %860 = vmatmul.mubr.bf16.gmra.mxu0 %v2471_v19 }
  0x80   : > { %867 = vmatprep.mubr.bf16.mxu0 %v2475_v20 }
  0x87   : > { %868 = vmatmul.mubr.bf16.gmra.mxu0 %v2477_v23 }
  0x88   : > { %875 = vmatprep.mubr.bf16.mxu0 %v2481_v24 }
  0x8f   : > { %876 = vmatmul.mubr.bf16.gmra.mxu0 %v2483_v26 }
  0xf7   : > { %v2152_v27 = vpop.f32.mrf.mxu0 }
  0xf9   : > { %v2153_v28 = vpop.f32.mrf.mxu0  ;;  %v2224_v1 = vpop.f32.mrf.mxu1 }
  0xfa   : > { %v2154_v31 = vadd.f32 %v2153_v28, %v2152_v27 }
  0xfb   : > { %v2155_v29 = vpop.f32.mrf.mxu0  ;;  %v2225_v8 = vpop.f32.mrf.mxu1 }
  0xfd   : > { %v2156_v30 = vpop.f32.mrf.mxu0  ;;  %v2227_v11 = vpop.f32.mrf.mxu1 }
  0xfe   : > { %v2157_v32 = vadd.f32 %v2156_v30, %v2155_v29 }
  0xff   : > { %v2158_v33 = vpop.f32.mrf.mxu0  ;;  %v2228_v17 = vpop.f32.mrf.mxu1 }
 0x100   : > { %v916_v34 = vpack.c.bf16 %v2157_v32, %v2154_v31 }
 0x101   : > { %v2159_v35 = vpop.f32.mrf.mxu0  ;;  %v2230_v20 = vpop.f32.mrf.mxu1 }
 0x102   : > { %2328 = vmatprep.mubr.bf16.mxu1 %v916_v34  ;;  %v2160_v38 = vadd.f32 %v2159_v35, %v2158_v33 }
 0x103   : > { %v2161_v36 = vpop.f32.mrf.mxu0  ;;  %v2231_v26 = vpop.f32.mrf.mxu1 }
 0x105   : > { %v2162_v37 = vpop.f32.mrf.mxu0  ;;  %v2233_v29 = vpop.f32.mrf.mxu1 }
 0x106   : > { %v2163_v39 = vadd.f32 %v2162_v37, %v2161_v36 }
 0x107   : > { %v2164_v40 = vpop.f32.mrf.mxu0  ;;  %v2234_v35 = vpop.f32.mrf.mxu1 }
 0x108   : > { %v917_v41 = vpack.c.bf16 %v2163_v39, %v2160_v38 }
 0x109   : > { %v2165_v42 = vpop.f32.mrf.mxu0  ;;  %v2236_v38 = vpop.f32.mrf.mxu1 }
 0x10a   : > { %2329 = vmatmul.mubr.bf16.vlgmr.msra.gmra.mxu1 %v917_v41  ;;  %v2166_v45 = vadd.f32 %v2165_v42, %v2164_v40 }
 0x10b   : > { %v2167_v43 = vpop.f32.mrf.mxu0 }
 0x10d   : > { %v2168_v44 = vpop.f32.mrf.mxu0 }
 0x10e   : > { %v2169_v46 = vadd.f32 %v2168_v44, %v2167_v43  ;;  %v2237_v44 = vpop.f32.mrf.mxu1 }
 0x10f   : > { %v2170_v47 = vpop.f32.mrf.mxu0 }
 0x110   : > { %v918_v48 = vpack.c.bf16 %v2169_v46, %v2166_v45 }
 0x111   : > { %v2171_v49 = vpop.f32.mrf.mxu0 }
 0x112   : > { %2332 = vmatprep.mubr.bf16.mxu1 %v918_v48  ;;  %v2172_v52 = vadd.f32 %v2171_v49, %v2170_v47  ;;  %v2239_v47 = vpop.f32.mrf.mxu1 }
 0x113   : > { %v2173_v50 = vpop.f32.mrf.mxu0 }
 0x115   : > { %v2174_v51 = vpop.f32.mrf.mxu0 }
 0x116   : > { %v2175_v53 = vadd.f32 %v2174_v51, %v2173_v50 }
 0x117   : > { %v2176_v7 = vpop.f32.mrf.mxu0 }
 0x118   : > { %v919_v54 = vpack.c.bf16 %v2175_v53, %v2172_v52  ;;  %v2240_v53 = vpop.f32.mrf.mxu1 }
 0x119   : > { %v2177_v55 = vpop.f32.mrf.mxu0 }
 0x11a   : > { %2333 = vmatmul.mubr.bf16.gmra.mxu1 %v919_v54  ;;  %v2178_v58 = vadd.f32 %v2177_v55, %v2176_v7  ;;  %v2226_v54 = vadd.f32 %v2225_v8, %v2224_v1  ;;  %v2229_v55 = vadd.f32 %v2228_v17, %v2227_v11  ;;  %v2954_v11 = vld [vmem:[%s343_s21] ss:$0 sm:$0xff] }
 0x11b   : > { %v2179_v56 = vpop.f32.mrf.mxu0 }
 0x11d   : > { %v2180_v57 = vpop.f32.mrf.mxu0 }
 0x11e   : > { %v2181_v59 = vadd.f32 %v2180_v57, %v2179_v56  ;;  %v2242_v57 = vpop.f32.mrf.mxu1 }
 0x11f   : > { %v2182_v60 = vpop.f32.mrf.mxu0 }
 0x120   : > { %v920_v61 = vpack.c.bf16 %v2181_v59, %v2178_v58 }
 0x121   : > { %v2183_v62 = vpop.f32.mrf.mxu0 }
 0x122   : > { %2336 = vmatprep.mubr.bf16.mxu1 %v920_v61  ;;  %v2184_v2 = vadd.f32 %v2183_v62, %v2182_v60  ;;  %v928_v61 = vpack.c.bf16 %v2229_v55, %v2226_v54  ;;  %v2243_v62 = vpop.f32.mrf.mxu1 }
 0x123   : > { %v2185_v63 = vpop.f32.mrf.mxu0  ;;  %v2244_v8 = vadd.f32 %v2243_v62, %v2242_v57 }
 0x125   : > { %v2186_v0 = vpop.f32.mrf.mxu0 }
 0x126   : > { %v2187_v3 = vadd.f32 %v2186_v0, %v2185_v63  ;;  %v2232_v63 = vadd.f32 %v2231_v26, %v2230_v20  ;;  %v2235_v0 = vadd.f32 %v2234_v35, %v2233_v29 }
 0x127   : > { %v2188_v4 = vpop.f32.mrf.mxu0 }
 0x128   : > { %v921_v5 = vpack.c.bf16 %v2187_v3, %v2184_v2  ;;  %v2238_v2 = vadd.f32 %v2237_v44, %v2236_v38  ;;  %v2241_v3 = vadd.f32 %v2240_v53, %v2239_v47 }
 0x129   : > { %v2189_v6 = vpop.f32.mrf.mxu0 }
 0x12a   : > { %2337 = vmatmul.mubr.bf16.gmra.mxu1 %v921_v5  ;;  %v2190_v12 = vadd.f32 %v2189_v6, %v2188_v4  ;;  %v2245_v4 = vpop.f32.mrf.mxu1  ;;  %v929_v5 = vpack.c.bf16 %v2235_v0, %v2232_v63  ;;  %v930_v1 = vpack.c.bf16 %v2241_v3, %v2238_v2 }
 0x12b   : > { %v2191_v9 = vpop.f32.mrf.mxu0 }
 0x12c   : > { %v2246_v6 = vpop.f32.mrf.mxu1 }
 0x12d   : > { %v2192_v10 = vpop.f32.mrf.mxu0 }
 0x12e   : > { %v2193_v13 = vadd.f32 %v2192_v10, %v2191_v9  ;;  %v2247_v9 = vadd.f32 %v2246_v6, %v2245_v4 }
 0x12f   : > { %v2194_v14 = vpop.f32.mrf.mxu0 }
 0x130   : > { %v922_v15 = vpack.c.bf16 %v2193_v13, %v2190_v12  ;;  %v931_v10 = vpack.c.bf16 %v2247_v9, %v2244_v8 }
 0x131   : > { %v2195_v16 = vpop.f32.mrf.mxu0 }
 0x132   : > { %2340 = vmatprep.mubr.bf16.mxu1 %v922_v15  ;;  %v2196_v21 = vadd.f32 %v2195_v16, %v2194_v14  ;;  %v1198_v15 = vstv %s1197_s22 }
 0x133   : > { %v2197_v18 = vpop.f32.mrf.mxu0  ;;  %vm2962_vm1 = vcmp.eq.s32.totalorder %v1198_v15, 1 }
 0x135   : > { %v2198_v19 = vpop.f32.mrf.mxu0 }
 0x136   : > { %v2199_v22 = vadd.f32 %v2198_v19, %v2197_v18 }
 0x137   : > { %v2200_v23 = vpop.f32.mrf.mxu0 }
 0x138   : > { %v923_v24 = vpack.c.bf16 %v2199_v22, %v2196_v21 }
 0x139   : > { %v2201_v25 = vpop.f32.mrf.mxu0 }
 0x13a   : > { %2341 = vmatmul.mubr.bf16.gmra.mxu1 %v923_v24  ;;  %v2202_v30 = vadd.f32 %v2201_v25, %v2200_v23 }
 0x13b   : > { %v2203_v27 = vpop.f32.mrf.mxu0 }
 0x13d   : > { %v2204_v28 = vpop.f32.mrf.mxu0 }
 0x13e   : > { %v2205_v31 = vadd.f32 %v2204_v28, %v2203_v27 }
 0x13f   : > { %v2206_v32 = vpop.f32.mrf.mxu0 }
 0x140   : > { %v924_v33 = vpack.c.bf16 %v2205_v31, %v2202_v30 }
 0x141   : > { %v2207_v34 = vpop.f32.mrf.mxu0 }
 0x142   : > { %2344 = vmatprep.mubr.bf16.mxu1 %v924_v33  ;;  %v2208_v39 = vadd.f32 %v2207_v34, %v2206_v32 }
 0x143   : > { %v2209_v36 = vpop.f32.mrf.mxu0 }
 0x145   : > { %v2210_v37 = vpop.f32.mrf.mxu0 }
 0x146   : > { %v2211_v40 = vadd.f32 %v2210_v37, %v2209_v36 }
 0x147   : > { %v2212_v41 = vpop.f32.mrf.mxu0 }
 0x148   : > { %v925_v42 = vpack.c.bf16 %v2211_v40, %v2208_v39 }
 0x149   : > { %v2213_v43 = vpop.f32.mrf.mxu0 }
 0x14a   : > { %2345 = vmatmul.mubr.bf16.gmra.mxu1 %v925_v42  ;;  %v2214_v48 = vadd.f32 %v2213_v43, %v2212_v41 }
 0x14b   : > { %v2215_v45 = vpop.f32.mrf.mxu0 }
 0x14d   : > { %v2216_v46 = vpop.f32.mrf.mxu0 }
 0x14e   : > { %v2217_v49 = vadd.f32 %v2216_v46, %v2215_v45 }
 0x14f   : > { %v2218_v50 = vpop.f32.mrf.mxu0 }
 0x150   : > { %v926_v51 = vpack.c.bf16 %v2217_v49, %v2214_v48 }
 0x151   : > { %v2219_v52 = vpop.f32.mrf.mxu0 }
 0x152   : > { %2348 = vmatprep.mubr.bf16.mxu1 %v926_v51  ;;  %v2220_v58 = vadd.f32 %v2219_v52, %v2218_v50 }
 0x153   : > { %v2221_v7 = vpop.f32.mrf.mxu0 }
 0x155   : > { %v2222_v56 = vpop.f32.mrf.mxu0 }
 0x156   : > { %v2223_v59 = vadd.f32 %v2222_v56, %v2221_v7 }
 0x158   : > { %v927_v60 = vpack.c.bf16 %v2223_v59, %v2220_v58 }
 0x15a   : > { %2349 = vmatmul.mubr.bf16.gmra.mxu1 %v927_v60 }
 0x15b   : > { %2352 = vmatprep.mubr.bf16.mxu1 %v928_v61 }
 0x162   : > { %2353 = vmatmul.mubr.bf16.gmra.mxu1 %v929_v5 }
 0x163   : > { %2356 = vmatprep.mubr.bf16.mxu1 %v930_v1 }
 0x16a   : > { %2357 = vmatmul.mubr.bf16.gmra.mxu1 %v931_v10 }
 0x1ca   : > { %v2330_v12 = vpop.f32.mrf.mxu1 }
 0x1cb   : > { %v1046_v13 = vadd.f32 %v2330_v12, %v2954_v11 }
 0x1cc   : > { %v1037_v14 = vpop.f32.mrf.mxu1 }
 0x1cd   : > { %v1038_v16 = vadd.f32 %v2954_v11, %v1037_v14  ;;  %v1167_v18 = vmax.f32 %v1046_v13, 0.0 }
 0x1ce   : > { %v2331_v17 = vpop.f32.mrf.mxu1 }
 0x1cf   : > { %v1049_v19 = vadd.f32 %v2331_v17, %v2954_v11  ;;  %v1165_v22 = vmax.f32 %v1038_v16, 0.0  ;;  %v1202_v25 = vsel %vm2962_vm1, %v1167_v18, %v1046_v13 }
 0x1d0   : > { %v1040_v21 = vpop.f32.mrf.mxu1 }
 0x1d1   : > { %v1168_v23 = vmax.f32 %v1049_v19, 0.0  ;;  %v1041_v24 = vadd.f32 %v2954_v11, %v1040_v21  ;;  %v1200_v29 = vsel %vm2962_vm1, %v1165_v22, %v1038_v16 }
 0x1d3   : > { %v1203_v26 = vsel %vm2962_vm1, %v1168_v23, %v1049_v19  ;;  %v1166_v27 = vmax.f32 %v1041_v24, 0.0 }
 0x1d4   : > { %v2049_v28 = vpack.c.bf16 %v1203_v26, %v1202_v25 }
 0x1d5   : > { %v1201_v30 = vsel %vm2962_vm1, %v1166_v27, %v1041_v24 }
 0x1d6   : > { %2121 = vst [vmem:[%s2975_s18 + $0x8] sm:$0xff] %v2049_v28   ;;  %v2044_v31 = vpack.c.bf16 %v1201_v30, %v1200_v29 }
 0x1d8   : > { %2045 = vst [vmem:[%s2975_s18] sm:$0xff] %v2044_v31  }
 0x1da   : > { %v2334_v32 = vpop.f32.mrf.mxu1 }
 0x1db   : > { %v1062_v33 = vadd.f32 %v2334_v32, %v2954_v11 }
 0x1dc   : > { %v1053_v34 = vpop.f32.mrf.mxu1 }
 0x1dd   : > { %v1054_v35 = vadd.f32 %v2954_v11, %v1053_v34  ;;  %v1171_v37 = vmax.f32 %v1062_v33, 0.0 }
 0x1de   : > { %v2335_v36 = vpop.f32.mrf.mxu1 }
 0x1df   : > { %v1065_v38 = vadd.f32 %v2335_v36, %v2954_v11  ;;  %v1169_v40 = vmax.f32 %v1054_v35, 0.0  ;;  %v1206_v43 = vsel %vm2962_vm1, %v1171_v37, %v1062_v33 }
 0x1e0   : > { %v1056_v39 = vpop.f32.mrf.mxu1 }
 0x1e1   : > { %v1172_v41 = vmax.f32 %v1065_v38, 0.0  ;;  %v1057_v42 = vadd.f32 %v2954_v11, %v1056_v39  ;;  %v1204_v47 = vsel %vm2962_vm1, %v1169_v40, %v1054_v35 }
 0x1e3   : > { %v1207_v44 = vsel %vm2962_vm1, %v1172_v41, %v1065_v38  ;;  %v1170_v45 = vmax.f32 %v1057_v42, 0.0 }
 0x1e4   : > { %v2059_v46 = vpack.c.bf16 %v1207_v44, %v1206_v43 }
 0x1e5   : > { %v1205_v48 = vsel %vm2962_vm1, %v1170_v45, %v1057_v42 }
 0x1e6   : > { %2123 = vst [vmem:[%s2975_s18 + $0x18] sm:$0xff] %v2059_v46   ;;  %v2054_v49 = vpack.c.bf16 %v1205_v48, %v1204_v47 }
 0x1e8   : > { %2122 = vst [vmem:[%s2975_s18 + $0x10] sm:$0xff] %v2054_v49  }
 0x1ea   : > { %v2338_v50 = vpop.f32.mrf.mxu1 }
 0x1eb   : > { %v1078_v51 = vadd.f32 %v2338_v50, %v2954_v11 }
 0x1ec   : > { %v1069_v52 = vpop.f32.mrf.mxu1 }
 0x1ed   : > { %v1070_v53 = vadd.f32 %v2954_v11, %v1069_v52  ;;  %v1175_v54 = vmax.f32 %v1078_v51, 0.0 }
 0x1ee   : > { %v2339_v7 = vpop.f32.mrf.mxu1 }
 0x1ef   : > { %v1081_v55 = vadd.f32 %v2339_v7, %v2954_v11  ;;  %v1173_v57 = vmax.f32 %v1070_v53, 0.0  ;;  %v1210_v60 = vsel %vm2962_vm1, %v1175_v54, %v1078_v51 }
 0x1f0   : > { %v1072_v56 = vpop.f32.mrf.mxu1 }
 0x1f1   : > { %v1176_v58 = vmax.f32 %v1081_v55, 0.0  ;;  %v1073_v59 = vadd.f32 %v2954_v11, %v1072_v56  ;;  %v1208_v0 = vsel %vm2962_vm1, %v1173_v57, %v1070_v53 }
 0x1f3   : > { %v1211_v61 = vsel %vm2962_vm1, %v1176_v58, %v1081_v55  ;;  %v1174_v62 = vmax.f32 %v1073_v59, 0.0 }
 0x1f4   : > { %v2069_v63 = vpack.c.bf16 %v1211_v61, %v1210_v60 }
 0x1f5   : > { %v1209_v2 = vsel %vm2962_vm1, %v1174_v62, %v1073_v59 }
 0x1f6   : > { %2125 = vst [vmem:[%s2975_s18 + $0x28] sm:$0xff] %v2069_v63   ;;  %v2064_v3 = vpack.c.bf16 %v1209_v2, %v1208_v0 }
 0x1f8   : > { %2124 = vst [vmem:[%s2975_s18 + $0x20] sm:$0xff] %v2064_v3  }
 0x1fa   : > { %v2342_v4 = vpop.f32.mrf.mxu1 }
 0x1fb   : > { %v1094_v5 = vadd.f32 %v2342_v4, %v2954_v11 }
 0x1fc   : > { %v1085_v1 = vpop.f32.mrf.mxu1 }
 0x1fd   : > { %v1086_v6 = vadd.f32 %v2954_v11, %v1085_v1  ;;  %v1179_v9 = vmax.f32 %v1094_v5, 0.0 }
 0x1fe   : > { %v2343_v8 = vpop.f32.mrf.mxu1 }
 0x1ff   : > { %v1097_v10 = vadd.f32 %v2343_v8, %v2954_v11  ;;  %v1177_v13 = vmax.f32 %v1086_v6, 0.0  ;;  %v1214_v16 = vsel %vm2962_vm1, %v1179_v9, %v1094_v5 }
 0x200   : > { %v1088_v12 = vpop.f32.mrf.mxu1 }
 0x201   : > { %v1180_v14 = vmax.f32 %v1097_v10, 0.0  ;;  %v1089_v15 = vadd.f32 %v2954_v11, %v1088_v12  ;;  %v1212_v21 = vsel %vm2962_vm1, %v1177_v13, %v1086_v6 }
 0x203   : > { %v1215_v17 = vsel %vm2962_vm1, %v1180_v14, %v1097_v10  ;;  %v1178_v18 = vmax.f32 %v1089_v15, 0.0 }
 0x204   : > { %v2079_v19 = vpack.c.bf16 %v1215_v17, %v1214_v16 }
 0x205   : > { %v1213_v22 = vsel %vm2962_vm1, %v1178_v18, %v1089_v15 }
 0x206   : > { %2127 = vst [vmem:[%s2975_s18 + $0x38] sm:$0xff] %v2079_v19   ;;  %v2074_v23 = vpack.c.bf16 %v1213_v22, %v1212_v21 }
 0x208   : > { %2126 = vst [vmem:[%s2975_s18 + $0x30] sm:$0xff] %v2074_v23  }
 0x20a   : > { %v2346_v24 = vpop.f32.mrf.mxu1 }
 0x20b   : > { %v1110_v25 = vadd.f32 %v2346_v24, %v2954_v11 }
 0x20c   : > { %v1101_v26 = vpop.f32.mrf.mxu1 }
 0x20d   : > { %v1102_v27 = vadd.f32 %v2954_v11, %v1101_v26  ;;  %v1183_v29 = vmax.f32 %v1110_v25, 0.0 }
 0x20e   : > { %v2347_v28 = vpop.f32.mrf.mxu1 }
 0x20f   : > { %v1113_v30 = vadd.f32 %v2347_v28, %v2954_v11  ;;  %v1181_v32 = vmax.f32 %v1102_v27, 0.0  ;;  %v1218_v35 = vsel %vm2962_vm1, %v1183_v29, %v1110_v25 }
 0x210   : > { %v1104_v31 = vpop.f32.mrf.mxu1 }
 0x211   : > { %v1184_v33 = vmax.f32 %v1113_v30, 0.0  ;;  %v1105_v34 = vadd.f32 %v2954_v11, %v1104_v31  ;;  %v1216_v39 = vsel %vm2962_vm1, %v1181_v32, %v1102_v27 }
 0x213   : > { %v1219_v36 = vsel %vm2962_vm1, %v1184_v33, %v1113_v30  ;;  %v1182_v37 = vmax.f32 %v1105_v34, 0.0 }
 0x214   : > { %v2089_v38 = vpack.c.bf16 %v1219_v36, %v1218_v35  ;;  %v2556_v35 = vmov (%p1396_p8), 0.0   ;;  %v2501_v36 = vld [vmem:[%s2975_s18 + $0x30] sm:$0xff] (%p1396_p8)  }
 0x215   : > { %v1217_v40 = vsel %vm2962_vm1, %v1182_v37, %v1105_v34  ;;  %v2499_v34 = vld [vmem:[%s2975_s18 + $0x38] sm:$0xff] (%p1396_p8)   ;;  %2360 = vmatprep.subr.bf16.mxu1 (%p1396_p8), %v2556_v35  ;;  %2376 = vmatprep.mubr.msk.bf16.mxu1 (%p1396_p8), %vm2557_vm2, %v2556_v35 }
 0x216   : > { %2129 = vst [vmem:[%s2975_s18 + $0x48] sm:$0xff] %v2089_v38   ;;  %v2084_v41 = vpack.c.bf16 %v1217_v40, %v1216_v39  ;;  %v2503_v38 = vld [vmem:[%s2975_s18 + $0x28] sm:$0xff] (%p1396_p8)   ;;  %v2505_v40 = vld [vmem:[%s2975_s18 + $0x20] sm:$0xff] (%p1396_p8)  }
 0x218   : > { %2128 = vst [vmem:[%s2975_s18 + $0x40] sm:$0xff] %v2084_v41  }
 0x21a   : > { %v2350_v42 = vpop.f32.mrf.mxu1 }
 0x21b   : > { %v1126_v43 = vadd.f32 %v2350_v42, %v2954_v11  ;;  %v2507_v42 = vld [vmem:[%s2975_s18 + $0x18] sm:$0xff] (%p1396_p8)  }
 0x21c   : > { %v1117_v44 = vpop.f32.mrf.mxu1 }
 0x21d   : > { %v1118_v45 = vadd.f32 %v2954_v11, %v1117_v44  ;;  %v1187_v47 = vmax.f32 %v1126_v43, 0.0  ;;  %v1402_v44 = vld [vmem:[%s3184_s2] sm:$0xff] (%p1396_p8) }
 0x21e   : > { %v2351_v46 = vpop.f32.mrf.mxu1 }
 0x21f   : > { %v1129_v48 = vadd.f32 %v2351_v46, %v2954_v11  ;;  %v1185_v50 = vmax.f32 %v1118_v45, 0.0  ;;  %v1222_v7 = vsel %vm2962_vm1, %v1187_v47, %v1126_v43  ;;  %v2516_v46 = vld [vmem:[%s3187_s5 + $0x38] sm:$0xff] (%p1396_p8)   ;;  %v2509_v47 = vld [vmem:[%s2975_s18 + $0x10] sm:$0xff] (%p1396_p8)  }
 0x220   : > { %v1120_v49 = vpop.f32.mrf.mxu1  ;;  %2361 = vmatpush3.bf16.msra.mxu1 (%p1396_p8), %v2516_v46 }
 0x221   : > { %v1188_v51 = vmax.f32 %v1129_v48, 0.0  ;;  %v1121_v52 = vadd.f32 %v2954_v11, %v1120_v49  ;;  %v1220_v59 = vsel %vm2962_vm1, %v1185_v50, %v1118_v45  ;;  %v1967_v45 = vcombine.high (%p1396_p8), %v1402_v44, %v1402_v44  ;;  %v2517_v49 = vld [vmem:[%s3187_s5 + $0x30] sm:$0xff] (%p1396_p8)   ;;  %v2511_v50 = vld [vmem:[%s2975_s18 + $0x8] sm:$0xff] (%p1396_p8)   ;;  %2362 = vmatprep.subr.bf16.mxu1 (%p1396_p8), %v2556_v35 }
 0x222   : > { %v2354_v53 = vpop.f32.mrf.mxu1 }
 0x223   : > { %v1223_v54 = vsel %vm2962_vm1, %v1188_v51, %v1129_v48  ;;  %v1186_v55 = vmax.f32 %v1121_v52, 0.0  ;;  %v1142_v56 = vadd.f32 %v2354_v53, %v2954_v11  ;;  %v2510_v48 = vld [vmem:[%s2975_s18 + $0x48] sm:$0xff] (%p1396_p8)   ;;  %1572 = vmatprep.mubr.bf16.mxu0 (%p1396_p8), %v1967_v45  ;;  %v2512_v51 = vld [vmem:[%s2975_s18 + $0x40] sm:$0xff] (%p1396_p8)  }
 0x224   : > { %v2099_v57 = vpack.c.bf16 %v1223_v54, %v1222_v7  ;;  %v1133_v58 = vpop.f32.mrf.mxu1  ;;  %2363 = vmatpush3.bf16.msra.mxu1 (%p1396_p8), %v2517_v49  ;;  %v2513_v53 = vld [vmem:[%s2975_s18] sm:$0xff] (%p1396_p8)   ;;  %v1966_v54 = vcombine.low (%p1396_p8), %v1402_v44, %v1402_v44 }
 0x225   : > { %v1221_v60 = vsel %vm2962_vm1, %v1186_v55, %v1121_v52  ;;  %v1134_v61 = vadd.f32 %v2954_v11, %v1133_v58  ;;  %v1191_v0 = vmax.f32 %v1142_v56, 0.0  ;;  %v2518_v52 = vld [vmem:[%s3187_s5 + $0x28] sm:$0xff] (%p1396_p8)   ;;  %2364 = vmatprep.subr.bf16.mxu1 (%p1396_p8), %v2556_v35  ;;  %v2519_v7 = vld [vmem:[%s3187_s5 + $0x20] sm:$0xff] (%p1396_p8)   ;;  %v2520_v55 = vld [vmem:[%s3187_s5 + $0x18] sm:$0xff] (%p1396_p8)  }
 0x226   : > { %2131 = vst [vmem:[%s2975_s18 + $0x58] sm:$0xff] %v2099_v57   ;;  %v2094_v62 = vpack.c.bf16 %v1221_v60, %v1220_v59  ;;  %v2355_v63 = vpop.f32.mrf.mxu1  ;;  %v2522_v57 = vld [vmem:[%s3187_s5 + $0x8] sm:$0xff] (%p1396_p8)   ;;  %v2523_v58 = vld [vmem:[%s3187_s5] sm:$0xff] (%p1396_p8)   ;;  %v2524_v59 = vld [vmem:[%s3189_s7 + $0x38] sm:$0xff] (%p1396_p8)  }
 0x227   : > { %v1145_v2 = vadd.f32 %v2355_v63, %v2954_v11  ;;  %v1189_v4 = vmax.f32 %v1134_v61, 0.0  ;;  %v1226_v8 = vsel %vm2962_vm1, %v1191_v0, %v1142_v56  ;;  %v2521_v56 = vld [vmem:[%s3187_s5 + $0x10] sm:$0xff] (%p1396_p8)   ;;  %v2528_v63 = vld [vmem:[%s3189_s7 + $0x18] sm:$0xff] (%p1396_p8)  }
 0x228   : > { %2130 = vst [vmem:[%s2975_s18 + $0x50] sm:$0xff] %v2094_v62   ;;  %v1136_v3 = vpop.f32.mrf.mxu1  ;;  %2365 = vmatpush3.bf16.msra.mxu1 (%p1396_p8), %v2518_v52  ;;  %v2525_v60 = vld [vmem:[%s3189_s7 + $0x30] sm:$0xff] (%p1396_p8)   ;;  %v2527_v62 = vld [vmem:[%s3189_s7 + $0x20] sm:$0xff] (%p1396_p8)  }
 0x229   : > { %v1192_v5 = vmax.f32 %v1145_v2, 0.0  ;;  %v1137_v1 = vadd.f32 %v2954_v11, %v1136_v3  ;;  %v1224_v15 = vsel %vm2962_vm1, %v1189_v4, %v1134_v61  ;;  %2366 = vmatprep.subr.bf16.mxu1 (%p1396_p8), %v2556_v35  ;;  %v2526_v61 = vld [vmem:[%s3189_s7 + $0x28] sm:$0xff] (%p1396_p8)   ;;  %v2529_v0 = vld [vmem:[%s3189_s7 + $0x10] sm:$0xff] (%p1396_p8)  }
 0x22a   : > { %v2358_v6 = vpop.f32.mrf.mxu1 }
 0x22b   : > { %v1227_v9 = vsel %vm2962_vm1, %v1192_v5, %v1145_v2  ;;  %v1190_v10 = vmax.f32 %v1137_v1, 0.0  ;;  %v1158_v12 = vadd.f32 %v2358_v6, %v2954_v11 }
 0x22c   : > { %v2109_v13 = vpack.c.bf16 %v1227_v9, %v1226_v8  ;;  %v1149_v14 = vpop.f32.mrf.mxu1  ;;  %2367 = vmatpush3.bf16.msra.mxu1 (%p1396_p8), %v2519_v7  ;;  %v2530_v9 = vld [vmem:[%s3189_s7 + $0x8] sm:$0xff] (%p1396_p8)  }
 0x22d   : > { %v1225_v16 = vsel %vm2962_vm1, %v1190_v10, %v1137_v1  ;;  %v1150_v17 = vadd.f32 %v2954_v11, %v1149_v14  ;;  %v1195_v21 = vmax.f32 %v1158_v12, 0.0  ;;  %v2506_v41 = vld [vmem:[%s2975_s18 + $0x58] sm:$0xff] (%p1396_p8)   ;;  %2368 = vmatprep.subr.bf16.mxu1 (%p1396_p8), %v2556_v35  ;;  %v2531_v10 = vld [vmem:[%s3189_s7] sm:$0xff] (%p1396_p8)  }
 0x22e   : > { %2133 = vst [vmem:[%s2975_s18 + $0x68] sm:$0xff] %v2109_v13   ;;  %v2104_v18 = vpack.c.bf16 %v1225_v16, %v1224_v15  ;;  %v2359_v19 = vpop.f32.mrf.mxu1 }
 0x22f   : > { %v1161_v22 = vadd.f32 %v2359_v19, %v2954_v11  ;;  %v1193_v24 = vmax.f32 %v1150_v17, 0.0  ;;  %v1230_v27 = vsel %vm2962_vm1, %v1195_v21, %v1158_v12  ;;  %v2508_v43 = vld [vmem:[%s2975_s18 + $0x50] sm:$0xff] (%p1396_p8)   ;;  %v1984_v12 = vld [vmem:[%s3188_s6] ss:$0 sm:$0xff] (%p1396_p8) }
 0x230   : > { %2132 = vst [vmem:[%s2975_s18 + $0x60] sm:$0xff] %v2104_v18   ;;  %v1152_v23 = vpop.f32.mrf.mxu1  ;;  %2369 = vmatpush3.bf16.msra.mxu1 (%p1396_p8), %v2520_v55  ;;  %v1993_v21 = vld [vmem:[%s3190_s8] ss:$0 sm:$0xff] (%p1396_p8) }
 0x231   : > { %v1196_v25 = vmax.f32 %v1161_v22, 0.0  ;;  %v1153_v26 = vadd.f32 %v2954_v11, %v1152_v23  ;;  %v1228_v31 = vsel %vm2962_vm1, %v1193_v24, %v1150_v17  ;;  %2370 = vmatprep.subr.bf16.mxu1 (%p1396_p8), %v2556_v35 }
 0x233   : > { %v1231_v28 = vsel %vm2962_vm1, %v1196_v25, %v1161_v22  ;;  %v1194_v29 = vmax.f32 %v1153_v26, 0.0 }
 0x234   : > { %v2119_v30 = vpack.c.bf16 %v1231_v28, %v1230_v27  ;;  %1401 = sbr.rel (!%p1396_p8) target bundleno = 1205 (0x4b5), region = 60  ;;  %2371 = vmatpush3.bf16.msra.mxu1 (%p1396_p8), %v2521_v56 }
 0x235   : > { %v1229_v32 = vsel %vm2962_vm1, %v1194_v29, %v1153_v26  ;;  %v2502_v37 = vld [vmem:[%s2975_s18 + $0x68] sm:$0xff] (%p1396_p8)   ;;  %2372 = vmatprep.subr.bf16.mxu1 (%p1396_p8), %v2556_v35 }
 0x236   : > { %2135 = vst [vmem:[%s2975_s18 + $0x78] sm:$0xff] %v2119_v30   ;;  %v2114_v33 = vpack.c.bf16 %v1229_v32, %v1228_v31 }
 0x237   : > { %v2504_v39 = vld [vmem:[%s2975_s18 + $0x60] sm:$0xff] (%p1396_p8)  }
 0x238   : > { %2134 = vst [vmem:[%s2975_s18 + $0x70] sm:$0xff] %v2114_v33   ;;  %2373 = vmatpush3.bf16.msra.mxu1 (%p1396_p8), %v2522_v57 }
 0x239   : > { %2374 = vmatprep.subr.bf16.mxu1 %v2556_v35 }
 0x23c   : > { %2375 = vmatpush3.bf16.msra.mxu1 %v2523_v58 }
 0x23d   : > { %v2498_v11 = vld [vmem:[%s2975_s18 + $0x78] sm:$0xff]  }
 0x23e   : > { %2272 = vmatprep.subr.bf16.mxu0 %v2498_v11 }
 0x23f   : > { %v2500_v20 = vld [vmem:[%s2975_s18 + $0x70] sm:$0xff]   ;;  %2273 = vmatpush3.bf16.msra.mxu0 %v2499_v34 }
 0x240   : > { %2274 = vmatprep.subr.bf16.mxu0 %v2500_v20 }
 0x243   : > { %2275 = vmatpush3.bf16.msra.mxu0 %v2501_v36 }
 0x244   : > { %2276 = vmatprep.subr.bf16.mxu0 %v2502_v37 }
 0x247   : > { %2277 = vmatpush3.bf16.msra.mxu0 %v2503_v38 }
 0x248   : > { %2278 = vmatprep.subr.bf16.mxu0 %v2504_v39 }
 0x24b   : > { %2279 = vmatpush3.bf16.msra.mxu0 %v2505_v40 }
 0x24c   : > { %2280 = vmatprep.subr.bf16.mxu0 %v2506_v41 }
 0x24f   : > { %2281 = vmatpush3.bf16.msra.mxu0 %v2507_v42 }
 0x250   : > { %2282 = vmatprep.subr.bf16.mxu0 %v2508_v43 }
 0x253   : > { %2283 = vmatpush3.bf16.msra.mxu0 %v2509_v47 }
 0x254   : > { %2284 = vmatprep.subr.bf16.mxu0 %v2510_v48 }
 0x257   : > { %2285 = vmatpush3.bf16.msra.mxu0 %v2511_v50 }
 0x258   : > { %2286 = vmatprep.subr.bf16.mxu0 %v2512_v51 }
 0x25b   : > { %2287 = vmatpush3.bf16.msra.mxu0 %v2513_v53 }
 0x25c   : > { %2380 = vmatprep.subr.bf16.mxu0 %v2556_v35 }
 0x25e   : > { %1573 = vmatmul.mubr.bf16.vlgmr.msra.gmra.mxu0 %v1966_v54 }
 0x25f   : > { %2396 = vmatprep.mubr.msk.bf16.mxu0 %vm2557_vm2, %v2556_v35  ;;  %2381 = vmatpush3.bf16.msra.mxu0 %v2524_v59 }
 0x260   : > { %2382 = vmatprep.subr.bf16.mxu0 %v2556_v35 }
 0x263   : > { %2383 = vmatpush3.bf16.msra.mxu0 %v2525_v60 }
 0x264   : > { %2384 = vmatprep.subr.bf16.mxu0 %v2556_v35 }
 0x267   : > { %2385 = vmatpush3.bf16.msra.mxu0 %v2526_v61 }
 0x268   : > { %2386 = vmatprep.subr.bf16.mxu0 %v2556_v35 }
 0x26b   : > { %2387 = vmatpush3.bf16.msra.mxu0 %v2527_v62 }
 0x26c   : > { %2388 = vmatprep.subr.bf16.mxu0 %v2556_v35 }
 0x26f   : > { %2389 = vmatpush3.bf16.msra.mxu0 %v2528_v63 }
 0x270   : > { %2390 = vmatprep.subr.bf16.mxu0 %v2556_v35 }
 0x273   : > { %2391 = vmatpush3.bf16.msra.mxu0 %v2529_v0 }
 0x274   : > { %2392 = vmatprep.subr.bf16.mxu0 %v2556_v35 }
 0x277   : > { %2393 = vmatpush3.bf16.msra.mxu0 %v2530_v9 }
 0x278   : > { %2394 = vmatprep.subr.bf16.mxu0 %v2556_v35 }
 0x27b   : > { %2395 = vmatpush3.bf16.msra.mxu0 %v2531_v10 }
 0x31e   : > { %v2288_v2 = vpop.f32.mrf.mxu0 }
 0x320   : > { %v2289_v3 = vpop.f32.mrf.mxu0 }
 0x321   : > { %v2290_v4 = vadd.f32 %v2289_v3, %v2288_v2 }
 0x322   : > { %v2291_v5 = vpop.f32.mrf.mxu0 }
 0x323   : > { %v1580_v1 = vmax.f32 %v2290_v4, 0.0 }
 0x324   : > { %v2292_v6 = vpop.f32.mrf.mxu0 }
 0x325   : > { %v1581_v8 = vpack.c.bf16 %v1580_v1, %v1580_v1 }
 0x327   : > { %2377 = vmatmul.mubr.bf16.vlgmr.msra.gmra.mxu1 %v1581_v8 }
 0x3e7   : > { %v1687_v13 = vpop.f32.mrf.mxu1 }
 0x3e8   : > { %v1688_v14 = vadd.f32 %v1984_v12, %v1687_v13 }
 0x3e9   : > { %v2378_v15 = vpop.f32.mrf.mxu1 }
 0x3ea   : > { %v1693_v16 = vmax.f32 %v1688_v14, 0.0 }
 0x3eb   : > { %v1690_v17 = vpop.f32.mrf.mxu1 }
 0x3ec   : > { %v1694_v18 = vpack.c.bf16 %v1693_v16, %v1693_v16 }
 0x3ed   : > { %v2379_v19 = vpop.f32.mrf.mxu1 }
 0x3ee   : > { %2397 = vmatmul.mubr.bf16.vlgmr.msra.gmra.mxu0 %v1694_v18 }
 0x4ae   : > { %v1800_v22 = vpop.f32.mrf.mxu0 }
 0x4af   : > { %v1801_v23 = vadd.f32 %v1993_v21, %v1800_v22 }
 0x4b0   : > { %v2398_v24 = vpop.f32.mrf.mxu0 }
 0x4b1   : > { %1806 = vst [vmem:[%s3191_s9] sm:$0xff] %v1801_v23 }
 0x4b2   : > { %v1803_v25 = vpop.f32.mrf.mxu0 }
 0x4b4   : > { %v2399_v26 = vpop.f32.mrf.mxu0 }
 0x4b5 PF: > { %s19_s11 = sadd.s32 1, %s2554_s11   ;;  %s3196_s30 = smov %s2550_s10 }
 0x4b6   : > { %p16_p9 = scmp.ge.s32.totalorder %s19_s11, 7   ;;  %s3197_s10 = smov %s3199_s12 }
 0x4b8   :  { %18 = sbr.rel (!%p16_p9) target bundleno = 2 (0x2), region = 93 }

</bundles_post_ra>
